<compile_context>
chip_gen: v7x
topology: tpu7x:2x2x1
jax: 0.10.0
libtpu: 0.0.40
codegen_flags: <defaults>
</compile_context>

<pallas_src>
import functools

import jax
import jax.numpy as jnp
from jax import lax
from jax.experimental import pallas as pl
from jax.experimental.pallas import tpu as pltpu

BN_EPS = 1e-5


# ----------------------------------------------------------------------------
# In-kernel helpers
# ----------------------------------------------------------------------------
def _bn_relu(h, gamma, beta):
    # BatchNorm1d in *training* mode (fresh nn.Module default): batch stats,
    # biased variance, eps=1e-5, then affine, then ReLU.
    # gamma is folded into the normalization scale (one VALU mul saved on the
    # serial chain); the short-path variance is clamped at 0 so rsqrt can
    # never see a (rounding-)negative argument.
    mu = jnp.mean(h, axis=0, keepdims=True)
    ms = jnp.mean(h * h, axis=0, keepdims=True)
    var = jnp.maximum(ms - mu * mu, 0.0)
    scale = gamma * lax.rsqrt(var + BN_EPS)
    return jnp.maximum((h - mu) * scale + beta, 0.0)


# ----------------------------------------------------------------------------
# Pallas kernel: whole rollout in one invocation (no grid, no pipelining)
# ----------------------------------------------------------------------------
def _traj_kernel(
    x_ref,        # (B, S)      initial state
    z_ref,        # (T, B, L)   per-step latents (time-major)
    g_ref,        # (T, B, G)   per-step goals   (time-major)
    wh_ref,       # (in_dim + H1 + 4, Hc)  rows: [W1; W2; g1; b1; g2; b2]
    wo_ref,       # (H2 + 1, S + A)        rows: [Wo; bo], cols [states|actions]
    states_ref,   # (T+1, B, S) output: gen_states (time-major)
    actions_ref,  # (T,   B, A) output: gen_actions (time-major)
    *, dims, use_bf16,
):
    L, S, G, H1, H2 = dims
    in_dim = L + S + G
    cdt = jnp.bfloat16 if use_bf16 else jnp.float32

    # --- unpack parameter slabs (static slices, hoisted out of the rollout) ---
    w1z = wh_ref[0:L, :H1].astype(cdt)
    w1x = wh_ref[L:L + S, :H1].astype(cdt)
    w1g = wh_ref[L + S:in_dim, :H1].astype(cdt)
    w2 = wh_ref[in_dim:in_dim + H1, :H2].astype(cdt)
    r = in_dim + H1
    gamma1 = wh_ref[r + 0:r + 1, :H1]
    beta1 = wh_ref[r + 1:r + 2, :H1]
    gamma2 = wh_ref[r + 2:r + 3, :H2]
    beta2 = wh_ref[r + 3:r + 4, :H2]
    # Output head stays in f32: the carried state is fed back T times, keeping
    # this one tiny (B x H2 x (S+A)) matmul exact limits error compounding.
    wo = wo_ref[0:H2, :]
    bo = wo_ref[H2:H2 + 1, :]

    T = z_ref.shape[0]

    x0 = x_ref[...]
    states_ref[0] = x0            # gen_states[:, 0, :] = x   (state_noise = 0)

    x_t = x0
    for ts in range(T):           # fully unrolled: T is static and small
        z_t = z_ref[ts]
        g_t = g_ref[ts]
        # layer 1: cat((z, x, g)) @ W1.  b1 dropped: train-mode BN subtracts
        # the batch mean, so a per-column bias cancels exactly.  The z/g dots
        # do not depend on the carried x_t, so they overlap in MXU slack.
        h1 = (jnp.dot(x_t.astype(cdt), w1x, preferred_element_type=jnp.float32)
              + jnp.dot(z_t.astype(cdt), w1z, preferred_element_type=jnp.float32)
              + jnp.dot(g_t.astype(cdt), w1g, preferred_element_type=jnp.float32))
        h1 = _bn_relu(h1, gamma1, beta1)
        # layer 2 (b2 cancels in BN likewise)
        h2 = jnp.dot(h1.astype(cdt), w2, preferred_element_type=jnp.float32)
        h2 = _bn_relu(h2, gamma2, beta2)
        # fused output head, columns [states | actions]; f32.
        o = jnp.dot(h2, wo, preferred_element_type=jnp.float32) + bo
        s = o[:, :S]                       # raw next state (lane-aligned slice)
        states_ref[ts + 1] = s
        # tanh on the EUP; the clamp after tanh is redundant at ac_noise = 0.
        actions_ref[ts] = jnp.tanh(o[:, S:])
        # TODO(synk): ac_noise / state_noise > 0 paths (torch.randn_like inside
        # the loop) are not implemented; the defaults (0.0) are exact.
        x_t = s


# ----------------------------------------------------------------------------
# One-time parameter packing (NOT per forward call)
# ----------------------------------------------------------------------------
def pack_params(params):
    """Pack the 12 small parameter arrays into two VMEM-friendly slabs.

    w_hidden rows: [W1 (in_dim); W2 (H1); gamma1; beta1; gamma2; beta2]
    w_out    rows: [Wo (H2); bo], columns ordered [states | actions].
    b1 / b2 are intentionally dropped: they cancel under train-mode BatchNorm.
    """
    h1 = params["w1"].shape[1]
    h2 = params["w2"].shape[1]
    hc = max(h1, h2)
    pad = lambda a: jnp.pad(a, ((0, 0), (0, hc - a.shape[1])))
    w_hidden = jnp.concatenate(
        [pad(params["w1"]), pad(params["w2"]),
         pad(params["gamma1"]), pad(params["beta1"]),
         pad(params["gamma2"]), pad(params["beta2"])], axis=0)
    wo = jnp.concatenate([params["wo_s"], params["wo_a"]], axis=1)
    bo = jnp.concatenate([params["bo_s"], params["bo_a"]], axis=1)
    w_out = jnp.concatenate([wo, bo], axis=0)
    return {"w_hidden": w_hidden, "w_out": w_out}


# ----------------------------------------------------------------------------
# Wrapper: one jitted dispatch for the whole forward
# ----------------------------------------------------------------------------
def _vmem_spec():
    return pl.BlockSpec(memory_space=pltpu.MemorySpace.VMEM)


@functools.partial(jax.jit, static_argnames=("use_bf16",))
def traj_generator_fc_pallas(packed, x, z_seq, g_seq, *, use_bf16=True):
    """x: (B,S) f32; z_seq: (T,B,L); g_seq: (T,B,G) or (B,G).
    Returns PyTorch-layout (gen_states (B,T+1,S), gen_actions (B,T,A),
    z_all (B,T,L))."""
    if g_seq.ndim == 2:  # 2-D goal path: repeat across timesteps
        g_seq = jnp.broadcast_to(g_seq[None], (z_seq.shape[0],) + g_seq.shape)
    T, B, L = z_seq.shape
    S = x.shape[-1]
    G = g_seq.shape[-1]
    w_hidden = packed["w_hidden"]
    w_out = packed["w_out"]
    in_dim = L + S + G
    H1 = w_hidden.shape[0] - in_dim - 4
    H2 = w_out.shape[0] - 1
    A = w_out.shape[1] - S

    kernel = functools.partial(
        _traj_kernel, dims=(L, S, G, H1, H2), use_bf16=use_bf16)

    states_tm, actions_tm = pl.pallas_call(
        kernel,
        out_shape=(jax.ShapeDtypeStruct((T + 1, B, S), jnp.float32),
                   jax.ShapeDtypeStruct((T, B, A), jnp.float32)),
        in_specs=[_vmem_spec()] * 5,
        out_specs=(_vmem_spec(), _vmem_spec()),
    )(x, z_seq, g_seq, w_hidden, w_out)

    # Tiny layout fix-ups back to PyTorch's (B, T, D); they fuse inside this
    # single jitted executable (no extra dispatches).
    gen_states = jnp.swapaxes(states_tm, 0, 1)     # (B, T+1, S)
    gen_actions = jnp.swapaxes(actions_tm, 0, 1)   # (B, T, A)
    z_all = jnp.swapaxes(z_seq, 0, 1)              # (B, T, L)
    # TODO(synk): BatchNorm running_mean/running_var updates (module state)
    # are not materialized; only the forward outputs are reproduced.
    return gen_states, gen_actions, z_all


# ----------------------------------------------------------------------------
# Pure-JAX reference (mirrors the PyTorch forward exactly, noise = 0)
# ----------------------------------------------------------------------------
def _bn_relu_ref(h, gamma, beta):
    mu = jnp.mean(h, axis=0, keepdims=True)
    var = jnp.mean((h - mu) ** 2, axis=0, keepdims=True)
    return jnp.maximum((h - mu) * lax.rsqrt(var + BN_EPS) * gamma + beta, 0.0)


def traj_generator_fc_ref(params, x, z_seq, g_seq):
    T = z_seq.shape[0]
    x_t = x
    states_list, actions_list = [], []
    for ts in range(T):
        inp = jnp.concatenate([z_seq[ts], x_t, g_seq[ts]], axis=-1)
        h1 = _bn_relu_ref(inp @ params["w1"] + params["b1"],
                          params["gamma1"], params["beta1"])
        h2 = _bn_relu_ref(h1 @ params["w2"] + params["b2"],
                          params["gamma2"], params["beta2"])
        a = jnp.clip(jnp.tanh(h2 @ params["wo_a"] + params["bo_a"]), -1.0, 1.0)
        s = h2 @ params["wo_s"] + params["bo_s"]
        states_list.append(s)
        actions_list.append(a)
        x_t = s
    gen_states = jnp.concatenate(
        [x[:, None, :], jnp.stack(states_list, axis=1)], axis=1)
    gen_actions = jnp.stack(actions_list, axis=1)
    return gen_states, gen_actions, jnp.swapaxes(z_seq, 0, 1)


# ----------------------------------------------------------------------------
# Deterministic synthetic parameters (PyTorch-Linear-like uniform init)
# ----------------------------------------------------------------------------
def init_params(key, state_dim, ac_dim, goal_dim, latent_dim, hidden):
    h1, h2 = hidden
    in_dim = latent_dim + state_dim + goal_dim   # cat order: (z, x, g)
    ks = jax.random.split(key, 8)

    def u(k, shape, fan_in):
        b = 1.0 / (fan_in ** 0.5)
        return jax.random.uniform(k, shape, jnp.float32, -b, b)

    return {
        "w1": u(ks[0], (in_dim, h1), in_dim),   # rows ordered [z | x | g]
        "b1": u(ks[1], (1, h1), in_dim),
        "gamma1": jnp.ones((1, h1), jnp.float32),
        "beta1": jnp.zeros((1, h1), jnp.float32),
        "w2": u(ks[2], (h1, h2), h1),
        "b2": u(ks[3], (1, h2), h1),
        "gamma2": jnp.ones((1, h2), jnp.float32),
        "beta2": jnp.zeros((1, h2), jnp.float32),
        # out_layer columns split as [ac_dim | state_dim] in PyTorch order
        "wo_a": u(ks[4], (h2, ac_dim), h2),
        "bo_a": u(ks[5], (1, ac_dim), h2),
        "wo_s": u(ks[6], (h2, state_dim), h2),
        "bo_s": u(ks[7], (1, state_dim), h2),
    }


if __name__ == "__main__":
    # small, module-consistent shapes
    B, state_dim, ac_dim, goal_dim, latent_dim = 4, 12, 6, 5, 8
    hidden = [32, 32]
    tau = 5  # num_steps

    root = jax.random.PRNGKey(0)
    kp, kz0, kx, kg, kzr = jax.random.split(root, 5)

    params = init_params(kp, state_dim, ac_dim, goal_dim, latent_dim, hidden)
    packed = pack_params(params)   # one-time packing, not per forward call

    x = jax.random.normal(kx, (B, state_dim), jnp.float32)
    z0 = jax.random.normal(kz0, (B, latent_dim), jnp.float32)
    # z is resampled (torch.randn_like) every step inside the PyTorch loop;
    # here the whole latent sequence is pre-sampled and fed in (time-major).
    z_rest = jax.random.normal(kzr, (tau - 1, B, latent_dim), jnp.float32)
    z_seq = jnp.concatenate([z0[None], z_rest], axis=0)          # (T, B, L)
    g = jax.random.normal(kg, (B, goal_dim), jnp.float32)
    g_seq = jnp.broadcast_to(g[None], (tau, B, goal_dim)).astype(jnp.float32)

    # --- exact path (f32 matmuls): tight check against the reference ---
    gs, ga, za = jax.block_until_ready(
        traj_generator_fc_pallas(packed, x, z_seq, g_seq, use_bf16=False))
    rs, ra, rz = traj_generator_fc_ref(params, x, z_seq, g_seq)

    assert gs.shape == (B, tau + 1, state_dim)
    assert ga.shape == (B, tau, ac_dim)
    assert za.shape == (B, tau, latent_dim)
    assert jnp.allclose(gs, rs, atol=1e-4, rtol=1e-4)
    assert jnp.allclose(ga, ra, atol=1e-4, rtol=1e-4)
    assert jnp.array_equal(za, rz)

    # --- fast path (bf16 MXU operands, default): loose sanity check ---
    # bf16 operand rounding through a 5-step rollout typically moves outputs
    # by ~1e-2; the strict correctness gate is the f32 path above.
    gs16, ga16, _ = jax.block_until_ready(
        traj_generator_fc_pallas(packed, x, z_seq, g_seq, use_bf16=True))
    assert bool(jnp.all(jnp.isfinite(gs16))) and bool(jnp.all(jnp.isfinite(ga16)))
    assert jnp.allclose(gs16, rs, atol=0.3, rtol=0.0)
    assert jnp.allclose(ga16, ra, atol=0.3, rtol=0.0)

    print("KERNEL_OK")
</pallas_src>

<mosaic_0001>
module attributes {stable_mosaic.version = 11 : i64} {
  func.func @_traj_kernel(%arg0: memref<4x12xf32, #tpu.memory_space<vmem>>, %arg1: memref<5x4x8xf32, #tpu.memory_space<vmem>>, %arg2: memref<5x4x5xf32, #tpu.memory_space<vmem>>, %arg3: memref<61x32xf32, #tpu.memory_space<vmem>>, %arg4: memref<33x18xf32, #tpu.memory_space<vmem>>, %arg5: memref<6x4x12xf32, #tpu.memory_space<vmem>>, %arg6: memref<5x4x6xf32, #tpu.memory_space<vmem>>) attributes {dimension_semantics = [], scalar_prefetch = 0 : i64, scratch_operands = 0 : i64, tpu.core_type = #tpu.core_type<tc>} {
    %c0 = arith.constant 0 : index
    %c0_0 = arith.constant 0 : index
    %0 = vector.load %arg3[%c0, %c0_0] : memref<61x32xf32, #tpu.memory_space<vmem>>, vector<8x32xf32>
    %c8 = arith.constant 8 : index
    %c0_1 = arith.constant 0 : index
    %1 = vector.load %arg3[%c8, %c0_1] : memref<61x32xf32, #tpu.memory_space<vmem>>, vector<12x32xf32>
    %c20 = arith.constant 20 : index
    %c0_2 = arith.constant 0 : index
    %2 = vector.load %arg3[%c20, %c0_2] : memref<61x32xf32, #tpu.memory_space<vmem>>, vector<5x32xf32>
    %c25 = arith.constant 25 : index
    %c0_3 = arith.constant 0 : index
    %3 = vector.load %arg3[%c25, %c0_3] : memref<61x32xf32, #tpu.memory_space<vmem>>, vector<32x32xf32>
    %c57 = arith.constant 57 : index
    %c0_4 = arith.constant 0 : index
    %4 = vector.load %arg3[%c57, %c0_4] : memref<61x32xf32, #tpu.memory_space<vmem>>, vector<1x32xf32>
    %c58 = arith.constant 58 : index
    %c0_5 = arith.constant 0 : index
    %5 = vector.load %arg3[%c58, %c0_5] : memref<61x32xf32, #tpu.memory_space<vmem>>, vector<1x32xf32>
    %c59 = arith.constant 59 : index
    %c0_6 = arith.constant 0 : index
    %6 = vector.load %arg3[%c59, %c0_6] : memref<61x32xf32, #tpu.memory_space<vmem>>, vector<1x32xf32>
    %c60 = arith.constant 60 : index
    %c0_7 = arith.constant 0 : index
    %7 = vector.load %arg3[%c60, %c0_7] : memref<61x32xf32, #tpu.memory_space<vmem>>, vector<1x32xf32>
    %c0_8 = arith.constant 0 : index
    %c0_9 = arith.constant 0 : index
    %8 = vector.load %arg4[%c0_8, %c0_9] : memref<33x18xf32, #tpu.memory_space<vmem>>, vector<32x18xf32>
    %c32 = arith.constant 32 : index
    %c0_10 = arith.constant 0 : index
    %9 = vector.load %arg4[%c32, %c0_10] : memref<33x18xf32, #tpu.memory_space<vmem>>, vector<1x18xf32>
    %c0_11 = arith.constant 0 : index
    %c0_12 = arith.constant 0 : index
    %10 = vector.load %arg0[%c0_11, %c0_12] : memref<4x12xf32, #tpu.memory_space<vmem>>, vector<4x12xf32>
    %c0_13 = arith.constant 0 : index
    %c0_14 = arith.constant 0 : index
    %c0_15 = arith.constant 0 : index
    %11 = vector.load %arg5[%c0_13, %c0_14, %c0_15] : memref<6x4x12xf32, #tpu.memory_space<vmem>>, vector<1x4x12xf32>
    %12 = vector.shape_cast %11 : vector<1x4x12xf32> to vector<4x12xf32>
    %13 = vector.shape_cast %10 : vector<4x12xf32> to vector<1x4x12xf32>
    tpu.vector_store %arg5[%c0_13, %c0_14, %c0_15], %13 {strides = array<i32>} : memref<6x4x12xf32, #tpu.memory_space<vmem>>, vector<1x4x12xf32>,
    %c0_16 = arith.constant 0 : index
    %c0_17 = arith.constant 0 : index
    %c0_18 = arith.constant 0 : index
    %14 = vector.load %arg1[%c0_16, %c0_17, %c0_18] : memref<5x4x8xf32, #tpu.memory_space<vmem>>, vector<1x4x8xf32>
    %15 = vector.shape_cast %14 : vector<1x4x8xf32> to vector<4x8xf32>
    %c0_19 = arith.constant 0 : index
    %c0_20 = arith.constant 0 : index
    %c0_21 = arith.constant 0 : index
    %16 = vector.load %arg2[%c0_19, %c0_20, %c0_21] : memref<5x4x5xf32, #tpu.memory_space<vmem>>, vector<1x4x5xf32>
    %17 = vector.shape_cast %16 : vector<1x4x5xf32> to vector<4x5xf32>
    %cst = arith.constant dense<0.000000e+00> : vector<4x32xf32>
    %18 = tpu.matmul %10, %1, %cst {dimension_numbers = #tpu.dot_dimension_numbers<[1], [0], [0], [1], [0, 0, 1, 1], [], []>} : vector<4x12xf32>, vector<12x32xf32>, vector<4x32xf32> -> vector<4x32xf32>
    %cst_22 = arith.constant dense<0.000000e+00> : vector<4x32xf32>
    %19 = tpu.matmul %15, %0, %cst_22 {dimension_numbers = #tpu.dot_dimension_numbers<[1], [0], [0], [1], [0, 0, 1, 1], [], []>} : vector<4x8xf32>, vector<8x32xf32>, vector<4x32xf32> -> vector<4x32xf32>
    %20 = arith.addf %18, %19 : vector<4x32xf32>
    %cst_23 = arith.constant dense<0.000000e+00> : vector<4x32xf32>
    %21 = tpu.matmul %17, %2, %cst_23 {dimension_numbers = #tpu.dot_dimension_numbers<[1], [0], [0], [1], [0, 0, 1, 1], [], []>} : vector<4x5xf32>, vector<5x32xf32>, vector<4x32xf32> -> vector<4x32xf32>
    %22 = arith.addf %20, %21 : vector<4x32xf32>
    %cst_24 = arith.constant dense<0.000000e+00> : vector<32xf32>
    %23 = vector.multi_reduction <add>, %22, %cst_24 [0] : vector<4x32xf32> to vector<32xf32>
    %24 = vector.shape_cast %23 : vector<32xf32> to vector<1x32xf32>
    %cst_25 = arith.constant 4.000000e+00 : f32
    %25 = vector.broadcast %cst_25 : f32 to vector<1x32xf32>
    %26 = arith.divf %24, %25 : vector<1x32xf32>
    %27 = arith.mulf %22, %22 : vector<4x32xf32>
    %cst_26 = arith.constant dense<0.000000e+00> : vector<32xf32>
    %28 = vector.multi_reduction <add>, %27, %cst_26 [0] : vector<4x32xf32> to vector<32xf32>
    %29 = vector.shape_cast %28 : vector<32xf32> to vector<1x32xf32>
    %cst_27 = arith.constant 4.000000e+00 : f32
    %30 = vector.broadcast %cst_27 : f32 to vector<1x32xf32>
    %31 = arith.divf %29, %30 : vector<1x32xf32>
    %32 = arith.mulf %26, %26 : vector<1x32xf32>
    %33 = arith.subf %31, %32 : vector<1x32xf32>
    %cst_28 = arith.constant 0.000000e+00 : f32
    %34 = vector.broadcast %cst_28 : f32 to vector<1x32xf32>
    %35 = arith.maximumf %33, %34 : vector<1x32xf32>
    %cst_29 = arith.constant 9.99999974E-6 : f32
    %36 = vector.broadcast %cst_29 : f32 to vector<1x32xf32>
    %37 = arith.addf %35, %36 : vector<1x32xf32>
    %38 = math.rsqrt %37 : vector<1x32xf32>
    %39 = arith.mulf %4, %38 : vector<1x32xf32>
    %40 = vector.broadcast %26 : vector<1x32xf32> to vector<4x32xf32>
    %41 = arith.subf %22, %40 : vector<4x32xf32>
    %42 = vector.broadcast %39 : vector<1x32xf32> to vector<4x32xf32>
    %43 = arith.mulf %41, %42 : vector<4x32xf32>
    %44 = vector.broadcast %5 : vector<1x32xf32> to vector<4x32xf32>
    %45 = arith.addf %43, %44 : vector<4x32xf32>
    %cst_30 = arith.constant 0.000000e+00 : f32
    %46 = vector.broadcast %cst_30 : f32 to vector<4x32xf32>
    %47 = arith.maximumf %45, %46 : vector<4x32xf32>
    %cst_31 = arith.constant dense<0.000000e+00> : vector<4x32xf32>
    %48 = tpu.matmul %47, %3, %cst_31 {dimension_numbers = #tpu.dot_dimension_numbers<[1], [0], [0], [1], [0, 0, 1, 1], [], []>} : vector<4x32xf32>, vector<32x32xf32>, vector<4x32xf32> -> vector<4x32xf32>
    %cst_32 = arith.constant dense<0.000000e+00> : vector<32xf32>
    %49 = vector.multi_reduction <add>, %48, %cst_32 [0] : vector<4x32xf32> to vector<32xf32>
    %50 = vector.shape_cast %49 : vector<32xf32> to vector<1x32xf32>
    %cst_33 = arith.constant 4.000000e+00 : f32
    %51 = vector.broadcast %cst_33 : f32 to vector<1x32xf32>
    %52 = arith.divf %50, %51 : vector<1x32xf32>
    %53 = arith.mulf %48, %48 : vector<4x32xf32>
    %cst_34 = arith.constant dense<0.000000e+00> : vector<32xf32>
    %54 = vector.multi_reduction <add>, %53, %cst_34 [0] : vector<4x32xf32> to vector<32xf32>
    %55 = vector.shape_cast %54 : vector<32xf32> to vector<1x32xf32>
    %cst_35 = arith.constant 4.000000e+00 : f32
    %56 = vector.broadcast %cst_35 : f32 to vector<1x32xf32>
    %57 = arith.divf %55, %56 : vector<1x32xf32>
    %58 = arith.mulf %52, %52 : vector<1x32xf32>
    %59 = arith.subf %57, %58 : vector<1x32xf32>
    %cst_36 = arith.constant 0.000000e+00 : f32
    %60 = vector.broadcast %cst_36 : f32 to vector<1x32xf32>
    %61 = arith.maximumf %59, %60 : vector<1x32xf32>
    %cst_37 = arith.constant 9.99999974E-6 : f32
    %62 = vector.broadcast %cst_37 : f32 to vector<1x32xf32>
    %63 = arith.addf %61, %62 : vector<1x32xf32>
    %64 = math.rsqrt %63 : vector<1x32xf32>
    %65 = arith.mulf %6, %64 : vector<1x32xf32>
    %66 = vector.broadcast %52 : vector<1x32xf32> to vector<4x32xf32>
    %67 = arith.subf %48, %66 : vector<4x32xf32>
    %68 = vector.broadcast %65 : vector<1x32xf32> to vector<4x32xf32>
    %69 = arith.mulf %67, %68 : vector<4x32xf32>
    %70 = vector.broadcast %7 : vector<1x32xf32> to vector<4x32xf32>
    %71 = arith.addf %69, %70 : vector<4x32xf32>
    %cst_38 = arith.constant 0.000000e+00 : f32
    %72 = vector.broadcast %cst_38 : f32 to vector<4x32xf32>
    %73 = arith.maximumf %71, %72 : vector<4x32xf32>
    %cst_39 = arith.constant dense<0.000000e+00> : vector<4x18xf32>
    %74 = tpu.matmul %73, %8, %cst_39 {dimension_numbers = #tpu.dot_dimension_numbers<[1], [0], [0], [1], [0, 0, 1, 1], [], []>} : vector<4x32xf32>, vector<32x18xf32>, vector<4x18xf32> -> vector<4x18xf32>
    %75 = vector.broadcast %9 : vector<1x18xf32> to vector<4x18xf32>
    %76 = arith.addf %74, %75 : vector<4x18xf32>
    %77 = vector.extract_strided_slice %76 {offsets = [0, 0], sizes = [4, 12], strides = [1, 1]} : vector<4x18xf32> to vector<4x12xf32>
    %c1 = arith.constant 1 : index
    %c0_40 = arith.constant 0 : index
    %c0_41 = arith.constant 0 : index
    %78 = vector.load %arg5[%c1, %c0_40, %c0_41] : memref<6x4x12xf32, #tpu.memory_space<vmem>>, vector<1x4x12xf32>
    %79 = vector.shape_cast %78 : vector<1x4x12xf32> to vector<4x12xf32>
    %80 = vector.shape_cast %77 : vector<4x12xf32> to vector<1x4x12xf32>
    tpu.vector_store %arg5[%c1, %c0_40, %c0_41], %80 {strides = array<i32>} : memref<6x4x12xf32, #tpu.memory_space<vmem>>, vector<1x4x12xf32>,
    %81 = vector.extract_strided_slice %76 {offsets = [0, 12], sizes = [4, 6], strides = [1, 1]} : vector<4x18xf32> to vector<4x6xf32>
    %82 = math.tanh %81 : vector<4x6xf32>
    %c0_42 = arith.constant 0 : index
    %c0_43 = arith.constant 0 : index
    %c0_44 = arith.constant 0 : index
    %83 = vector.load %arg6[%c0_42, %c0_43, %c0_44] : memref<5x4x6xf32, #tpu.memory_space<vmem>>, vector<1x4x6xf32>
    %84 = vector.shape_cast %83 : vector<1x4x6xf32> to vector<4x6xf32>
    %85 = vector.shape_cast %82 : vector<4x6xf32> to vector<1x4x6xf32>
    tpu.vector_store %arg6[%c0_42, %c0_43, %c0_44], %85 {strides = array<i32>} : memref<5x4x6xf32, #tpu.memory_space<vmem>>, vector<1x4x6xf32>,
    %c1_45 = arith.constant 1 : index
    %c0_46 = arith.constant 0 : index
    %c0_47 = arith.constant 0 : index
    %86 = vector.load %arg1[%c1_45, %c0_46, %c0_47] : memref<5x4x8xf32, #tpu.memory_space<vmem>>, vector<1x4x8xf32>
    %87 = vector.shape_cast %86 : vector<1x4x8xf32> to vector<4x8xf32>
    %c1_48 = arith.constant 1 : index
    %c0_49 = arith.constant 0 : index
    %c0_50 = arith.constant 0 : index
    %88 = vector.load %arg2[%c1_48, %c0_49, %c0_50] : memref<5x4x5xf32, #tpu.memory_space<vmem>>, vector<1x4x5xf32>
    %89 = vector.shape_cast %88 : vector<1x4x5xf32> to vector<4x5xf32>
    %cst_51 = arith.constant dense<0.000000e+00> : vector<4x32xf32>
    %90 = tpu.matmul %77, %1, %cst_51 {dimension_numbers = #tpu.dot_dimension_numbers<[1], [0], [0], [1], [0, 0, 1, 1], [], []>} : vector<4x12xf32>, vector<12x32xf32>, vector<4x32xf32> -> vector<4x32xf32>
    %cst_52 = arith.constant dense<0.000000e+00> : vector<4x32xf32>
    %91 = tpu.matmul %87, %0, %cst_52 {dimension_numbers = #tpu.dot_dimension_numbers<[1], [0], [0], [1], [0, 0, 1, 1], [], []>} : vector<4x8xf32>, vector<8x32xf32>, vector<4x32xf32> -> vector<4x32xf32>
    %92 = arith.addf %90, %91 : vector<4x32xf32>
    %cst_53 = arith.constant dense<0.000000e+00> : vector<4x32xf32>
    %93 = tpu.matmul %89, %2, %cst_53 {dimension_numbers = #tpu.dot_dimension_numbers<[1], [0], [0], [1], [0, 0, 1, 1], [], []>} : vector<4x5xf32>, vector<5x32xf32>, vector<4x32xf32> -> vector<4x32xf32>
    %94 = arith.addf %92, %93 : vector<4x32xf32>
    %cst_54 = arith.constant dense<0.000000e+00> : vector<32xf32>
    %95 = vector.multi_reduction <add>, %94, %cst_54 [0] : vector<4x32xf32> to vector<32xf32>
    %96 = vector.shape_cast %95 : vector<32xf32> to vector<1x32xf32>
    %cst_55 = arith.constant 4.000000e+00 : f32
    %97 = vector.broadcast %cst_55 : f32 to vector<1x32xf32>
    %98 = arith.divf %96, %97 : vector<1x32xf32>
    %99 = arith.mulf %94, %94 : vector<4x32xf32>
    %cst_56 = arith.constant dense<0.000000e+00> : vector<32xf32>
    %100 = vector.multi_reduction <add>, %99, %cst_56 [0] : vector<4x32xf32> to vector<32xf32>
    %101 = vector.shape_cast %100 : vector<32xf32> to vector<1x32xf32>
    %cst_57 = arith.constant 4.000000e+00 : f32
    %102 = vector.broadcast %cst_57 : f32 to vector<1x32xf32>
    %103 = arith.divf %101, %102 : vector<1x32xf32>
    %104 = arith.mulf %98, %98 : vector<1x32xf32>
    %105 = arith.subf %103, %104 : vector<1x32xf32>
    %cst_58 = arith.constant 0.000000e+00 : f32
    %106 = vector.broadcast %cst_58 : f32 to vector<1x32xf32>
    %107 = arith.maximumf %105, %106 : vector<1x32xf32>
    %cst_59 = arith.constant 9.99999974E-6 : f32
    %108 = vector.broadcast %cst_59 : f32 to vector<1x32xf32>
    %109 = arith.addf %107, %108 : vector<1x32xf32>
    %110 = math.rsqrt %109 : vector<1x32xf32>
    %111 = arith.mulf %4, %110 : vector<1x32xf32>
    %112 = vector.broadcast %98 : vector<1x32xf32> to vector<4x32xf32>
    %113 = arith.subf %94, %112 : vector<4x32xf32>
    %114 = vector.broadcast %111 : vector<1x32xf32> to vector<4x32xf32>
    %115 = arith.mulf %113, %114 : vector<4x32xf32>
    %116 = vector.broadcast %5 : vector<1x32xf32> to vector<4x32xf32>
    %117 = arith.addf %115, %116 : vector<4x32xf32>
    %cst_60 = arith.constant 0.000000e+00 : f32
    %118 = vector.broadcast %cst_60 : f32 to vector<4x32xf32>
    %119 = arith.maximumf %117, %118 : vector<4x32xf32>
    %cst_61 = arith.constant dense<0.000000e+00> : vector<4x32xf32>
    %120 = tpu.matmul %119, %3, %cst_61 {dimension_numbers = #tpu.dot_dimension_numbers<[1], [0], [0], [1], [0, 0, 1, 1], [], []>} : vector<4x32xf32>, vector<32x32xf32>, vector<4x32xf32> -> vector<4x32xf32>
    %cst_62 = arith.constant dense<0.000000e+00> : vector<32xf32>
    %121 = vector.multi_reduction <add>, %120, %cst_62 [0] : vector<4x32xf32> to vector<32xf32>
    %122 = vector.shape_cast %121 : vector<32xf32> to vector<1x32xf32>
    %cst_63 = arith.constant 4.000000e+00 : f32
    %123 = vector.broadcast %cst_63 : f32 to vector<1x32xf32>
    %124 = arith.divf %122, %123 : vector<1x32xf32>
    %125 = arith.mulf %120, %120 : vector<4x32xf32>
    %cst_64 = arith.constant dense<0.000000e+00> : vector<32xf32>
    %126 = vector.multi_reduction <add>, %125, %cst_64 [0] : vector<4x32xf32> to vector<32xf32>
    %127 = vector.shape_cast %126 : vector<32xf32> to vector<1x32xf32>
    %cst_65 = arith.constant 4.000000e+00 : f32
    %128 = vector.broadcast %cst_65 : f32 to vector<1x32xf32>
    %129 = arith.divf %127, %128 : vector<1x32xf32>
    %130 = arith.mulf %124, %124 : vector<1x32xf32>
    %131 = arith.subf %129, %130 : vector<1x32xf32>
    %cst_66 = arith.constant 0.000000e+00 : f32
    %132 = vector.broadcast %cst_66 : f32 to vector<1x32xf32>
    %133 = arith.maximumf %131, %132 : vector<1x32xf32>
    %cst_67 = arith.constant 9.99999974E-6 : f32
    %134 = vector.broadcast %cst_67 : f32 to vector<1x32xf32>
    %135 = arith.addf %133, %134 : vector<1x32xf32>
    %136 = math.rsqrt %135 : vector<1x32xf32>
    %137 = arith.mulf %6, %136 : vector<1x32xf32>
    %138 = vector.broadcast %124 : vector<1x32xf32> to vector<4x32xf32>
    %139 = arith.subf %120, %138 : vector<4x32xf32>
    %140 = vector.broadcast %137 : vector<1x32xf32> to vector<4x32xf32>
    %141 = arith.mulf %139, %140 : vector<4x32xf32>
    %142 = vector.broadcast %7 : vector<1x32xf32> to vector<4x32xf32>
    %143 = arith.addf %141, %142 : vector<4x32xf32>
    %cst_68 = arith.constant 0.000000e+00 : f32
    %144 = vector.broadcast %cst_68 : f32 to vector<4x32xf32>
    %145 = arith.maximumf %143, %144 : vector<4x32xf32>
    %cst_69 = arith.constant dense<0.000000e+00> : vector<4x18xf32>
    %146 = tpu.matmul %145, %8, %cst_69 {dimension_numbers = #tpu.dot_dimension_numbers<[1], [0], [0], [1], [0, 0, 1, 1], [], []>} : vector<4x32xf32>, vector<32x18xf32>, vector<4x18xf32> -> vector<4x18xf32>
    %147 = vector.broadcast %9 : vector<1x18xf32> to vector<4x18xf32>
    %148 = arith.addf %146, %147 : vector<4x18xf32>
    %149 = vector.extract_strided_slice %148 {offsets = [0, 0], sizes = [4, 12], strides = [1, 1]} : vector<4x18xf32> to vector<4x12xf32>
    %c2 = arith.constant 2 : index
    %c0_70 = arith.constant 0 : index
    %c0_71 = arith.constant 0 : index
    %150 = vector.load %arg5[%c2, %c0_70, %c0_71] : memref<6x4x12xf32, #tpu.memory_space<vmem>>, vector<1x4x12xf32>
    %151 = vector.shape_cast %150 : vector<1x4x12xf32> to vector<4x12xf32>
    %152 = vector.shape_cast %149 : vector<4x12xf32> to vector<1x4x12xf32>
    tpu.vector_store %arg5[%c2, %c0_70, %c0_71], %152 {strides = array<i32>} : memref<6x4x12xf32, #tpu.memory_space<vmem>>, vector<1x4x12xf32>,
    %153 = vector.extract_strided_slice %148 {offsets = [0, 12], sizes = [4, 6], strides = [1, 1]} : vector<4x18xf32> to vector<4x6xf32>
    %154 = math.tanh %153 : vector<4x6xf32>
    %c1_72 = arith.constant 1 : index
    %c0_73 = arith.constant 0 : index
    %c0_74 = arith.constant 0 : index
    %155 = vector.load %arg6[%c1_72, %c0_73, %c0_74] : memref<5x4x6xf32, #tpu.memory_space<vmem>>, vector<1x4x6xf32>
    %156 = vector.shape_cast %155 : vector<1x4x6xf32> to vector<4x6xf32>
    %157 = vector.shape_cast %154 : vector<4x6xf32> to vector<1x4x6xf32>
    tpu.vector_store %arg6[%c1_72, %c0_73, %c0_74], %157 {strides = array<i32>} : memref<5x4x6xf32, #tpu.memory_space<vmem>>, vector<1x4x6xf32>,
    %c2_75 = arith.constant 2 : index
    %c0_76 = arith.constant 0 : index
    %c0_77 = arith.constant 0 : index
    %158 = vector.load %arg1[%c2_75, %c0_76, %c0_77] : memref<5x4x8xf32, #tpu.memory_space<vmem>>, vector<1x4x8xf32>
    %159 = vector.shape_cast %158 : vector<1x4x8xf32> to vector<4x8xf32>
    %c2_78 = arith.constant 2 : index
    %c0_79 = arith.constant 0 : index
    %c0_80 = arith.constant 0 : index
    %160 = vector.load %arg2[%c2_78, %c0_79, %c0_80] : memref<5x4x5xf32, #tpu.memory_space<vmem>>, vector<1x4x5xf32>
    %161 = vector.shape_cast %160 : vector<1x4x5xf32> to vector<4x5xf32>
    %cst_81 = arith.constant dense<0.000000e+00> : vector<4x32xf32>
    %162 = tpu.matmul %149, %1, %cst_81 {dimension_numbers = #tpu.dot_dimension_numbers<[1], [0], [0], [1], [0, 0, 1, 1], [], []>} : vector<4x12xf32>, vector<12x32xf32>, vector<4x32xf32> -> vector<4x32xf32>
    %cst_82 = arith.constant dense<0.000000e+00> : vector<4x32xf32>
    %163 = tpu.matmul %159, %0, %cst_82 {dimension_numbers = #tpu.dot_dimension_numbers<[1], [0], [0], [1], [0, 0, 1, 1], [], []>} : vector<4x8xf32>, vector<8x32xf32>, vector<4x32xf32> -> vector<4x32xf32>
    %164 = arith.addf %162, %163 : vector<4x32xf32>
    %cst_83 = arith.constant dense<0.000000e+00> : vector<4x32xf32>
    %165 = tpu.matmul %161, %2, %cst_83 {dimension_numbers = #tpu.dot_dimension_numbers<[1], [0], [0], [1], [0, 0, 1, 1], [], []>} : vector<4x5xf32>, vector<5x32xf32>, vector<4x32xf32> -> vector<4x32xf32>
    %166 = arith.addf %164, %165 : vector<4x32xf32>
    %cst_84 = arith.constant dense<0.000000e+00> : vector<32xf32>
    %167 = vector.multi_reduction <add>, %166, %cst_84 [0] : vector<4x32xf32> to vector<32xf32>
    %168 = vector.shape_cast %167 : vector<32xf32> to vector<1x32xf32>
    %cst_85 = arith.constant 4.000000e+00 : f32
    %169 = vector.broadcast %cst_85 : f32 to vector<1x32xf32>
    %170 = arith.divf %168, %169 : vector<1x32xf32>
    %171 = arith.mulf %166, %166 : vector<4x32xf32>
    %cst_86 = arith.constant dense<0.000000e+00> : vector<32xf32>
    %172 = vector.multi_reduction <add>, %171, %cst_86 [0] : vector<4x32xf32> to vector<32xf32>
    %173 = vector.shape_cast %172 : vector<32xf32> to vector<1x32xf32>
    %cst_87 = arith.constant 4.000000e+00 : f32
    %174 = vector.broadcast %cst_87 : f32 to vector<1x32xf32>
    %175 = arith.divf %173, %174 : vector<1x32xf32>
    %176 = arith.mulf %170, %170 : vector<1x32xf32>
    %177 = arith.subf %175, %176 : vector<1x32xf32>
    %cst_88 = arith.constant 0.000000e+00 : f32
    %178 = vector.broadcast %cst_88 : f32 to vector<1x32xf32>
    %179 = arith.maximumf %177, %178 : vector<1x32xf32>
    %cst_89 = arith.constant 9.99999974E-6 : f32
    %180 = vector.broadcast %cst_89 : f32 to vector<1x32xf32>
    %181 = arith.addf %179, %180 : vector<1x32xf32>
    %182 = math.rsqrt %181 : vector<1x32xf32>
    %183 = arith.mulf %4, %182 : vector<1x32xf32>
    %184 = vector.broadcast %170 : vector<1x32xf32> to vector<4x32xf32>
    %185 = arith.subf %166, %184 : vector<4x32xf32>
    %186 = vector.broadcast %183 : vector<1x32xf32> to vector<4x32xf32>
    %187 = arith.mulf %185, %186 : vector<4x32xf32>
    %188 = vector.broadcast %5 : vector<1x32xf32> to vector<4x32xf32>
    %189 = arith.addf %187, %188 : vector<4x32xf32>
    %cst_90 = arith.constant 0.000000e+00 : f32
    %190 = vector.broadcast %cst_90 : f32 to vector<4x32xf32>
    %191 = arith.maximumf %189, %190 : vector<4x32xf32>
    %cst_91 = arith.constant dense<0.000000e+00> : vector<4x32xf32>
    %192 = tpu.matmul %191, %3, %cst_91 {dimension_numbers = #tpu.dot_dimension_numbers<[1], [0], [0], [1], [0, 0, 1, 1], [], []>} : vector<4x32xf32>, vector<32x32xf32>, vector<4x32xf32> -> vector<4x32xf32>
    %cst_92 = arith.constant dense<0.000000e+00> : vector<32xf32>
    %193 = vector.multi_reduction <add>, %192, %cst_92 [0] : vector<4x32xf32> to vector<32xf32>
    %194 = vector.shape_cast %193 : vector<32xf32> to vector<1x32xf32>
    %cst_93 = arith.constant 4.000000e+00 : f32
    %195 = vector.broadcast %cst_93 : f32 to vector<1x32xf32>
    %196 = arith.divf %194, %195 : vector<1x32xf32>
    %197 = arith.mulf %192, %192 : vector<4x32xf32>
    %cst_94 = arith.constant dense<0.000000e+00> : vector<32xf32>
    %198 = vector.multi_reduction <add>, %197, %cst_94 [0] : vector<4x32xf32> to vector<32xf32>
    %199 = vector.shape_cast %198 : vector<32xf32> to vector<1x32xf32>
    %cst_95 = arith.constant 4.000000e+00 : f32
    %200 = vector.broadcast %cst_95 : f32 to vector<1x32xf32>
    %201 = arith.divf %199, %200 : vector<1x32xf32>
    %202 = arith.mulf %196, %196 : vector<1x32xf32>
    %203 = arith.subf %201, %202 : vector<1x32xf32>
    %cst_96 = arith.constant 0.000000e+00 : f32
    %204 = vector.broadcast %cst_96 : f32 to vector<1x32xf32>
    %205 = arith.maximumf %203, %204 : vector<1x32xf32>
    %cst_97 = arith.constant 9.99999974E-6 : f32
    %206 = vector.broadcast %cst_97 : f32 to vector<1x32xf32>
    %207 = arith.addf %205, %206 : vector<1x32xf32>
    %208 = math.rsqrt %207 : vector<1x32xf32>
    %209 = arith.mulf %6, %208 : vector<1x32xf32>
    %210 = vector.broadcast %196 : vector<1x32xf32> to vector<4x32xf32>
    %211 = arith.subf %192, %210 : vector<4x32xf32>
    %212 = vector.broadcast %209 : vector<1x32xf32> to vector<4x32xf32>
    %213 = arith.mulf %211, %212 : vector<4x32xf32>
    %214 = vector.broadcast %7 : vector<1x32xf32> to vector<4x32xf32>
    %215 = arith.addf %213, %214 : vector<4x32xf32>
    %cst_98 = arith.constant 0.000000e+00 : f32
    %216 = vector.broadcast %cst_98 : f32 to vector<4x32xf32>
    %217 = arith.maximumf %215, %216 : vector<4x32xf32>
    %cst_99 = arith.constant dense<0.000000e+00> : vector<4x18xf32>
    %218 = tpu.matmul %217, %8, %cst_99 {dimension_numbers = #tpu.dot_dimension_numbers<[1], [0], [0], [1], [0, 0, 1, 1], [], []>} : vector<4x32xf32>, vector<32x18xf32>, vector<4x18xf32> -> vector<4x18xf32>
    %219 = vector.broadcast %9 : vector<1x18xf32> to vector<4x18xf32>
    %220 = arith.addf %218, %219 : vector<4x18xf32>
    %221 = vector.extract_strided_slice %220 {offsets = [0, 0], sizes = [4, 12], strides = [1, 1]} : vector<4x18xf32> to vector<4x12xf32>
    %c3 = arith.constant 3 : index
    %c0_100 = arith.constant 0 : index
    %c0_101 = arith.constant 0 : index
    %222 = vector.load %arg5[%c3, %c0_100, %c0_101] : memref<6x4x12xf32, #tpu.memory_space<vmem>>, vector<1x4x12xf32>
    %223 = vector.shape_cast %222 : vector<1x4x12xf32> to vector<4x12xf32>
    %224 = vector.shape_cast %221 : vector<4x12xf32> to vector<1x4x12xf32>
    tpu.vector_store %arg5[%c3, %c0_100, %c0_101], %224 {strides = array<i32>} : memref<6x4x12xf32, #tpu.memory_space<vmem>>, vector<1x4x12xf32>,
    %225 = vector.extract_strided_slice %220 {offsets = [0, 12], sizes = [4, 6], strides = [1, 1]} : vector<4x18xf32> to vector<4x6xf32>
    %226 = math.tanh %225 : vector<4x6xf32>
    %c2_102 = arith.constant 2 : index
    %c0_103 = arith.constant 0 : index
    %c0_104 = arith.constant 0 : index
    %227 = vector.load %arg6[%c2_102, %c0_103, %c0_104] : memref<5x4x6xf32, #tpu.memory_space<vmem>>, vector<1x4x6xf32>
    %228 = vector.shape_cast %227 : vector<1x4x6xf32> to vector<4x6xf32>
    %229 = vector.shape_cast %226 : vector<4x6xf32> to vector<1x4x6xf32>
    tpu.vector_store %arg6[%c2_102, %c0_103, %c0_104], %229 {strides = array<i32>} : memref<5x4x6xf32, #tpu.memory_space<vmem>>, vector<1x4x6xf32>,
    %c3_105 = arith.constant 3 : index
    %c0_106 = arith.constant 0 : index
    %c0_107 = arith.constant 0 : index
    %230 = vector.load %arg1[%c3_105, %c0_106, %c0_107] : memref<5x4x8xf32, #tpu.memory_space<vmem>>, vector<1x4x8xf32>
    %231 = vector.shape_cast %230 : vector<1x4x8xf32> to vector<4x8xf32>
    %c3_108 = arith.constant 3 : index
    %c0_109 = arith.constant 0 : index
    %c0_110 = arith.constant 0 : index
    %232 = vector.load %arg2[%c3_108, %c0_109, %c0_110] : memref<5x4x5xf32, #tpu.memory_space<vmem>>, vector<1x4x5xf32>
    %233 = vector.shape_cast %232 : vector<1x4x5xf32> to vector<4x5xf32>
    %cst_111 = arith.constant dense<0.000000e+00> : vector<4x32xf32>
    %234 = tpu.matmul %221, %1, %cst_111 {dimension_numbers = #tpu.dot_dimension_numbers<[1], [0], [0], [1], [0, 0, 1, 1], [], []>} : vector<4x12xf32>, vector<12x32xf32>, vector<4x32xf32> -> vector<4x32xf32>
    %cst_112 = arith.constant dense<0.000000e+00> : vector<4x32xf32>
    %235 = tpu.matmul %231, %0, %cst_112 {dimension_numbers = #tpu.dot_dimension_numbers<[1], [0], [0], [1], [0, 0, 1, 1], [], []>} : vector<4x8xf32>, vector<8x32xf32>, vector<4x32xf32> -> vector<4x32xf32>
    %236 = arith.addf %234, %235 : vector<4x32xf32>
    %cst_113 = arith.constant dense<0.000000e+00> : vector<4x32xf32>
    %237 = tpu.matmul %233, %2, %cst_113 {dimension_numbers = #tpu.dot_dimension_numbers<[1], [0], [0], [1], [0, 0, 1, 1], [], []>} : vector<4x5xf32>, vector<5x32xf32>, vector<4x32xf32> -> vector<4x32xf32>
    %238 = arith.addf %236, %237 : vector<4x32xf32>
    %cst_114 = arith.constant dense<0.000000e+00> : vector<32xf32>
    %239 = vector.multi_reduction <add>, %238, %cst_114 [0] : vector<4x32xf32> to vector<32xf32>
    %240 = vector.shape_cast %239 : vector<32xf32> to vector<1x32xf32>
    %cst_115 = arith.constant 4.000000e+00 : f32
    %241 = vector.broadcast %cst_115 : f32 to vector<1x32xf32>
    %242 = arith.divf %240, %241 : vector<1x32xf32>
    %243 = arith.mulf %238, %238 : vector<4x32xf32>
    %cst_116 = arith.constant dense<0.000000e+00> : vector<32xf32>
    %244 = vector.multi_reduction <add>, %243, %cst_116 [0] : vector<4x32xf32> to vector<32xf32>
    %245 = vector.shape_cast %244 : vector<32xf32> to vector<1x32xf32>
    %cst_117 = arith.constant 4.000000e+00 : f32
    %246 = vector.broadcast %cst_117 : f32 to vector<1x32xf32>
    %247 = arith.divf %245, %246 : vector<1x32xf32>
    %248 = arith.mulf %242, %242 : vector<1x32xf32>
    %249 = arith.subf %247, %248 : vector<1x32xf32>
    %cst_118 = arith.constant 0.000000e+00 : f32
    %250 = vector.broadcast %cst_118 : f32 to vector<1x32xf32>
    %251 = arith.maximumf %249, %250 : vector<1x32xf32>
    %cst_119 = arith.constant 9.99999974E-6 : f32
    %252 = vector.broadcast %cst_119 : f32 to vector<1x32xf32>
    %253 = arith.addf %251, %252 : vector<1x32xf32>
    %254 = math.rsqrt %253 : vector<1x32xf32>
    %255 = arith.mulf %4, %254 : vector<1x32xf32>
    %256 = vector.broadcast %242 : vector<1x32xf32> to vector<4x32xf32>
    %257 = arith.subf %238, %256 : vector<4x32xf32>
    %258 = vector.broadcast %255 : vector<1x32xf32> to vector<4x32xf32>
    %259 = arith.mulf %257, %258 : vector<4x32xf32>
    %260 = vector.broadcast %5 : vector<1x32xf32> to vector<4x32xf32>
    %261 = arith.addf %259, %260 : vector<4x32xf32>
    %cst_120 = arith.constant 0.000000e+00 : f32
    %262 = vector.broadcast %cst_120 : f32 to vector<4x32xf32>
    %263 = arith.maximumf %261, %262 : vector<4x32xf32>
    %cst_121 = arith.constant dense<0.000000e+00> : vector<4x32xf32>
    %264 = tpu.matmul %263, %3, %cst_121 {dimension_numbers = #tpu.dot_dimension_numbers<[1], [0], [0], [1], [0, 0, 1, 1], [], []>} : vector<4x32xf32>, vector<32x32xf32>, vector<4x32xf32> -> vector<4x32xf32>
    %cst_122 = arith.constant dense<0.000000e+00> : vector<32xf32>
    %265 = vector.multi_reduction <add>, %264, %cst_122 [0] : vector<4x32xf32> to vector<32xf32>
    %266 = vector.shape_cast %265 : vector<32xf32> to vector<1x32xf32>
    %cst_123 = arith.constant 4.000000e+00 : f32
    %267 = vector.broadcast %cst_123 : f32 to vector<1x32xf32>
    %268 = arith.divf %266, %267 : vector<1x32xf32>
    %269 = arith.mulf %264, %264 : vector<4x32xf32>
    %cst_124 = arith.constant dense<0.000000e+00> : vector<32xf32>
    %270 = vector.multi_reduction <add>, %269, %cst_124 [0] : vector<4x32xf32> to vector<32xf32>
    %271 = vector.shape_cast %270 : vector<32xf32> to vector<1x32xf32>
    %cst_125 = arith.constant 4.000000e+00 : f32
    %272 = vector.broadcast %cst_125 : f32 to vector<1x32xf32>
    %273 = arith.divf %271, %272 : vector<1x32xf32>
    %274 = arith.mulf %268, %268 : vector<1x32xf32>
    %275 = arith.subf %273, %274 : vector<1x32xf32>
    %cst_126 = arith.constant 0.000000e+00 : f32
    %276 = vector.broadcast %cst_126 : f32 to vector<1x32xf32>
    %277 = arith.maximumf %275, %276 : vector<1x32xf32>
    %cst_127 = arith.constant 9.99999974E-6 : f32
    %278 = vector.broadcast %cst_127 : f32 to vector<1x32xf32>
    %279 = arith.addf %277, %278 : vector<1x32xf32>
    %280 = math.rsqrt %279 : vector<1x32xf32>
    %281 = arith.mulf %6, %280 : vector<1x32xf32>
    %282 = vector.broadcast %268 : vector<1x32xf32> to vector<4x32xf32>
    %283 = arith.subf %264, %282 : vector<4x32xf32>
    %284 = vector.broadcast %281 : vector<1x32xf32> to vector<4x32xf32>
    %285 = arith.mulf %283, %284 : vector<4x32xf32>
    %286 = vector.broadcast %7 : vector<1x32xf32> to vector<4x32xf32>
    %287 = arith.addf %285, %286 : vector<4x32xf32>
    %cst_128 = arith.constant 0.000000e+00 : f32
    %288 = vector.broadcast %cst_128 : f32 to vector<4x32xf32>
    %289 = arith.maximumf %287, %288 : vector<4x32xf32>
    %cst_129 = arith.constant dense<0.000000e+00> : vector<4x18xf32>
    %290 = tpu.matmul %289, %8, %cst_129 {dimension_numbers = #tpu.dot_dimension_numbers<[1], [0], [0], [1], [0, 0, 1, 1], [], []>} : vector<4x32xf32>, vector<32x18xf32>, vector<4x18xf32> -> vector<4x18xf32>
    %291 = vector.broadcast %9 : vector<1x18xf32> to vector<4x18xf32>
    %292 = arith.addf %290, %291 : vector<4x18xf32>
    %293 = vector.extract_strided_slice %292 {offsets = [0, 0], sizes = [4, 12], strides = [1, 1]} : vector<4x18xf32> to vector<4x12xf32>
    %c4 = arith.constant 4 : index
    %c0_130 = arith.constant 0 : index
    %c0_131 = arith.constant 0 : index
    %294 = vector.load %arg5[%c4, %c0_130, %c0_131] : memref<6x4x12xf32, #tpu.memory_space<vmem>>, vector<1x4x12xf32>
    %295 = vector.shape_cast %294 : vector<1x4x12xf32> to vector<4x12xf32>
    %296 = vector.shape_cast %293 : vector<4x12xf32> to vector<1x4x12xf32>
    tpu.vector_store %arg5[%c4, %c0_130, %c0_131], %296 {strides = array<i32>} : memref<6x4x12xf32, #tpu.memory_space<vmem>>, vector<1x4x12xf32>,
    %297 = vector.extract_strided_slice %292 {offsets = [0, 12], sizes = [4, 6], strides = [1, 1]} : vector<4x18xf32> to vector<4x6xf32>
    %298 = math.tanh %297 : vector<4x6xf32>
    %c3_132 = arith.constant 3 : index
    %c0_133 = arith.constant 0 : index
    %c0_134 = arith.constant 0 : index
    %299 = vector.load %arg6[%c3_132, %c0_133, %c0_134] : memref<5x4x6xf32, #tpu.memory_space<vmem>>, vector<1x4x6xf32>
    %300 = vector.shape_cast %299 : vector<1x4x6xf32> to vector<4x6xf32>
    %301 = vector.shape_cast %298 : vector<4x6xf32> to vector<1x4x6xf32>
    tpu.vector_store %arg6[%c3_132, %c0_133, %c0_134], %301 {strides = array<i32>} : memref<5x4x6xf32, #tpu.memory_space<vmem>>, vector<1x4x6xf32>,
    %c4_135 = arith.constant 4 : index
    %c0_136 = arith.constant 0 : index
    %c0_137 = arith.constant 0 : index
    %302 = vector.load %arg1[%c4_135, %c0_136, %c0_137] : memref<5x4x8xf32, #tpu.memory_space<vmem>>, vector<1x4x8xf32>
    %303 = vector.shape_cast %302 : vector<1x4x8xf32> to vector<4x8xf32>
    %c4_138 = arith.constant 4 : index
    %c0_139 = arith.constant 0 : index
    %c0_140 = arith.constant 0 : index
    %304 = vector.load %arg2[%c4_138, %c0_139, %c0_140] : memref<5x4x5xf32, #tpu.memory_space<vmem>>, vector<1x4x5xf32>
    %305 = vector.shape_cast %304 : vector<1x4x5xf32> to vector<4x5xf32>
    %cst_141 = arith.constant dense<0.000000e+00> : vector<4x32xf32>
    %306 = tpu.matmul %293, %1, %cst_141 {dimension_numbers = #tpu.dot_dimension_numbers<[1], [0], [0], [1], [0, 0, 1, 1], [], []>} : vector<4x12xf32>, vector<12x32xf32>, vector<4x32xf32> -> vector<4x32xf32>
    %cst_142 = arith.constant dense<0.000000e+00> : vector<4x32xf32>
    %307 = tpu.matmul %303, %0, %cst_142 {dimension_numbers = #tpu.dot_dimension_numbers<[1], [0], [0], [1], [0, 0, 1, 1], [], []>} : vector<4x8xf32>, vector<8x32xf32>, vector<4x32xf32> -> vector<4x32xf32>
    %308 = arith.addf %306, %307 : vector<4x32xf32>
    %cst_143 = arith.constant dense<0.000000e+00> : vector<4x32xf32>
    %309 = tpu.matmul %305, %2, %cst_143 {dimension_numbers = #tpu.dot_dimension_numbers<[1], [0], [0], [1], [0, 0, 1, 1], [], []>} : vector<4x5xf32>, vector<5x32xf32>, vector<4x32xf32> -> vector<4x32xf32>
    %310 = arith.addf %308, %309 : vector<4x32xf32>
    %cst_144 = arith.constant dense<0.000000e+00> : vector<32xf32>
    %311 = vector.multi_reduction <add>, %310, %cst_144 [0] : vector<4x32xf32> to vector<32xf32>
    %312 = vector.shape_cast %311 : vector<32xf32> to vector<1x32xf32>
    %cst_145 = arith.constant 4.000000e+00 : f32
    %313 = vector.broadcast %cst_145 : f32 to vector<1x32xf32>
    %314 = arith.divf %312, %313 : vector<1x32xf32>
    %315 = arith.mulf %310, %310 : vector<4x32xf32>
    %cst_146 = arith.constant dense<0.000000e+00> : vector<32xf32>
    %316 = vector.multi_reduction <add>, %315, %cst_146 [0] : vector<4x32xf32> to vector<32xf32>
    %317 = vector.shape_cast %316 : vector<32xf32> to vector<1x32xf32>
    %cst_147 = arith.constant 4.000000e+00 : f32
    %318 = vector.broadcast %cst_147 : f32 to vector<1x32xf32>
    %319 = arith.divf %317, %318 : vector<1x32xf32>
    %320 = arith.mulf %314, %314 : vector<1x32xf32>
    %321 = arith.subf %319, %320 : vector<1x32xf32>
    %cst_148 = arith.constant 0.000000e+00 : f32
    %322 = vector.broadcast %cst_148 : f32 to vector<1x32xf32>
    %323 = arith.maximumf %321, %322 : vector<1x32xf32>
    %cst_149 = arith.constant 9.99999974E-6 : f32
    %324 = vector.broadcast %cst_149 : f32 to vector<1x32xf32>
    %325 = arith.addf %323, %324 : vector<1x32xf32>
    %326 = math.rsqrt %325 : vector<1x32xf32>
    %327 = arith.mulf %4, %326 : vector<1x32xf32>
    %328 = vector.broadcast %314 : vector<1x32xf32> to vector<4x32xf32>
    %329 = arith.subf %310, %328 : vector<4x32xf32>
    %330 = vector.broadcast %327 : vector<1x32xf32> to vector<4x32xf32>
    %331 = arith.mulf %329, %330 : vector<4x32xf32>
    %332 = vector.broadcast %5 : vector<1x32xf32> to vector<4x32xf32>
    %333 = arith.addf %331, %332 : vector<4x32xf32>
    %cst_150 = arith.constant 0.000000e+00 : f32
    %334 = vector.broadcast %cst_150 : f32 to vector<4x32xf32>
    %335 = arith.maximumf %333, %334 : vector<4x32xf32>
    %cst_151 = arith.constant dense<0.000000e+00> : vector<4x32xf32>
    %336 = tpu.matmul %335, %3, %cst_151 {dimension_numbers = #tpu.dot_dimension_numbers<[1], [0], [0], [1], [0, 0, 1, 1], [], []>} : vector<4x32xf32>, vector<32x32xf32>, vector<4x32xf32> -> vector<4x32xf32>
    %cst_152 = arith.constant dense<0.000000e+00> : vector<32xf32>
    %337 = vector.multi_reduction <add>, %336, %cst_152 [0] : vector<4x32xf32> to vector<32xf32>
    %338 = vector.shape_cast %337 : vector<32xf32> to vector<1x32xf32>
    %cst_153 = arith.constant 4.000000e+00 : f32
    %339 = vector.broadcast %cst_153 : f32 to vector<1x32xf32>
    %340 = arith.divf %338, %339 : vector<1x32xf32>
    %341 = arith.mulf %336, %336 : vector<4x32xf32>
    %cst_154 = arith.constant dense<0.000000e+00> : vector<32xf32>
    %342 = vector.multi_reduction <add>, %341, %cst_154 [0] : vector<4x32xf32> to vector<32xf32>
    %343 = vector.shape_cast %342 : vector<32xf32> to vector<1x32xf32>
    %cst_155 = arith.constant 4.000000e+00 : f32
    %344 = vector.broadcast %cst_155 : f32 to vector<1x32xf32>
    %345 = arith.divf %343, %344 : vector<1x32xf32>
    %346 = arith.mulf %340, %340 : vector<1x32xf32>
    %347 = arith.subf %345, %346 : vector<1x32xf32>
    %cst_156 = arith.constant 0.000000e+00 : f32
    %348 = vector.broadcast %cst_156 : f32 to vector<1x32xf32>
    %349 = arith.maximumf %347, %348 : vector<1x32xf32>
    %cst_157 = arith.constant 9.99999974E-6 : f32
    %350 = vector.broadcast %cst_157 : f32 to vector<1x32xf32>
    %351 = arith.addf %349, %350 : vector<1x32xf32>
    %352 = math.rsqrt %351 : vector<1x32xf32>
    %353 = arith.mulf %6, %352 : vector<1x32xf32>
    %354 = vector.broadcast %340 : vector<1x32xf32> to vector<4x32xf32>
    %355 = arith.subf %336, %354 : vector<4x32xf32>
    %356 = vector.broadcast %353 : vector<1x32xf32> to vector<4x32xf32>
    %357 = arith.mulf %355, %356 : vector<4x32xf32>
    %358 = vector.broadcast %7 : vector<1x32xf32> to vector<4x32xf32>
    %359 = arith.addf %357, %358 : vector<4x32xf32>
    %cst_158 = arith.constant 0.000000e+00 : f32
    %360 = vector.broadcast %cst_158 : f32 to vector<4x32xf32>
    %361 = arith.maximumf %359, %360 : vector<4x32xf32>
    %cst_159 = arith.constant dense<0.000000e+00> : vector<4x18xf32>
    %362 = tpu.matmul %361, %8, %cst_159 {dimension_numbers = #tpu.dot_dimension_numbers<[1], [0], [0], [1], [0, 0, 1, 1], [], []>} : vector<4x32xf32>, vector<32x18xf32>, vector<4x18xf32> -> vector<4x18xf32>
    %363 = vector.broadcast %9 : vector<1x18xf32> to vector<4x18xf32>
    %364 = arith.addf %362, %363 : vector<4x18xf32>
    %365 = vector.extract_strided_slice %364 {offsets = [0, 0], sizes = [4, 12], strides = [1, 1]} : vector<4x18xf32> to vector<4x12xf32>
    %c5 = arith.constant 5 : index
    %c0_160 = arith.constant 0 : index
    %c0_161 = arith.constant 0 : index
    %366 = vector.load %arg5[%c5, %c0_160, %c0_161] : memref<6x4x12xf32, #tpu.memory_space<vmem>>, vector<1x4x12xf32>
    %367 = vector.shape_cast %366 : vector<1x4x12xf32> to vector<4x12xf32>
    %368 = vector.shape_cast %365 : vector<4x12xf32> to vector<1x4x12xf32>
    tpu.vector_store %arg5[%c5, %c0_160, %c0_161], %368 {strides = array<i32>} : memref<6x4x12xf32, #tpu.memory_space<vmem>>, vector<1x4x12xf32>,
    %369 = vector.extract_strided_slice %364 {offsets = [0, 12], sizes = [4, 6], strides = [1, 1]} : vector<4x18xf32> to vector<4x6xf32>
    %370 = math.tanh %369 : vector<4x6xf32>
    %c4_162 = arith.constant 4 : index
    %c0_163 = arith.constant 0 : index
    %c0_164 = arith.constant 0 : index
    %371 = vector.load %arg6[%c4_162, %c0_163, %c0_164] : memref<5x4x6xf32, #tpu.memory_space<vmem>>, vector<1x4x6xf32>
    %372 = vector.shape_cast %371 : vector<1x4x6xf32> to vector<4x6xf32>
    %373 = vector.shape_cast %370 : vector<4x6xf32> to vector<1x4x6xf32>
    tpu.vector_store %arg6[%c4_162, %c0_163, %c0_164], %373 {strides = array<i32>} : memref<5x4x6xf32, #tpu.memory_space<vmem>>, vector<1x4x6xf32>,
    return
  }
}

</mosaic_0001>

<bundles_post_ra>
// kernel: traj_generator_fc_pallas.1
= control target key start
LH: loop header
LB: loop body
LE: loop exit
PB: predicated region body
PF: predicated region fallthrough
CT: control target
= control target key end

     0   :  { %12 = vsyncpa [#allocation3], 0  ;;  %vm46_vm0 = vcmask 64512   ;;  %v2817_v2 = vmov 0.0   ;;  %vm2818_vm1 = vmmov 0   ;;  %vm124_vm2 = vcmask 1043456   ;;  %s3230_s0 = inlined_call_operand.vmem [shape: f32[4,12], index: 0, kind: input, shape index: {}]   ;;  %s3231_s1 = inlined_call_operand.vmem [shape: f32[5,4,8], index: 1, kind: input, shape index: {}]   ;;  %s3232_s2 = inlined_call_operand.vmem [shape: f32[5,4,5], index: 2, kind: input, shape index: {}]   ;;  %s3233_s3 = inlined_call_operand.vmem [shape: f32[61,32], index: 3, kind: input, shape index: {}]   ;;  %s3234_s4 = inlined_call_operand.vmem [shape: f32[33,18], index: 4, kind: input, shape index: {}]   ;;  %s3235_s5 = inlined_call_operand.hbm [shape: f32[6,4,12], index: 5, kind: output, shape index: {0}]   ;;  %s3236_s6 = inlined_call_operand.hbm [shape: f32[5,4,6], index: 6, kind: output, shape index: {1}]  }
   0x1   :  { %v2864_v0 = vld [vmem:[%s3233_s3] sm:$0xff]  ;;  %2436 = vmatprep.subr.mxu0 %v2817_v2  ;;  %2438 = vmatprep.mubr.msk.f32.mxu0 %vm2818_vm1, %v2817_v2  ;;  %v25_v3 = vld [vmem:[%s3233_s3 + $0x8] sm:$0xff]  ;;  %v26_v4 = vld [vmem:[%s3233_s3 + $0x10] sm:$0xf]  ;;  %vm2819_vm3 = vmmov 1   ;;  %vm42_vm5 = vcmask 93184  }
   0x2   :  { %v44_v1 = vld [vmem:[%s3231_s1] sm:$0xf]  ;;  %2437 = vmatpush3.msra.mxu0 %v2864_v0  ;;  %v2879_v5 = vpack.c.bf16 %v26_v4, %v25_v3  ;;  %vm2881_vm4 = vmpackc.low %vm124_vm2, %vm2819_vm3  ;;  %v2820_v8 = vmov 0.0|0.0  }
   0x3   :  { %v41_v7 = vld [vmem:[%s3230_s0] sm:$0xf]  ;;  %2635 = vmatprep.subr.bf16.mxu1 %v2820_v8  ;;  %2439 = vmatmul.mubr.msk.f32.vlgmr.msra.gmra.mrb[0].mxu0 %vm46_vm0, %v44_v1 }
   0x4   :  { %2631 = vmatprep.subr.bf16.mxu0 %v2820_v8  ;;  %43 = vst.msk [vmem:[#allocation2] sm:$0xf] %vm42_vm5, %v41_v7  ;;  %2445 = vmatprep.mubr.msk.f32.mxu0 %vm2818_vm1, %v2817_v2 }
   0x5   :  { %2634 = vmatpush3.bf16.msk.msra.mxu0 %vm2881_vm4, %v2879_v5 }
   0x6   :  { %13 = vsyncpa [#allocation5], 0  ;;  %2448 = vmatprep.subr.mxu0 %v2817_v2  ;;  %2461 = vmatprep.mubr.msk.f32.mxu1 %vm2818_vm1, %v2817_v2  ;;  %vm120_vm6 = vcmask 97280   ;;  %v2903_v9 = vld [vmem:[%s3233_s3 + $0x14] sm:$0x1f]  ;;  %vm202_vm7 = vcmask 1044480   ;;  %v303_v40 = vlaneseq }
   0x7   :  { %v45_v10 = vld [vmem:[%s3232_s2] sm:$0xf]  ;;  %vm198_vm8 = vcmask 39936   ;;  %v30_v14 = vld [vmem:[%s3233_s3 + $0x29] sm:$0xff]  ;;  %v31_v15 = vld [vmem:[%s3233_s3 + $0x31] sm:$0xff]  ;;  %vm277_vm9 = vcmask 257024  }
   0x8   :  { %v28_v11 = vld [vmem:[%s3233_s3 + $0x19] sm:$0xff]  ;;  %v29_v12 = vld [vmem:[%s3233_s3 + $0x21] sm:$0xff]  ;;  %v2935_v16 = vpack.c.bf16 %v31_v15, %v30_v14  ;;  %v304_v41 = vshrl.u32 %v303_v40, 7  ;;  %vm314_vm10 = vcmask 261120   ;;  %v38_v55 = vld [vmem:[%s3234_s4 + $0x10] sm:$0xff]  ;;  %s2821_s13 = smov 116  }
   0x9   :  { %v2925_v13 = vpack.c.bf16 %v29_v12, %v28_v11  ;;  %v2944_v42 = vld [vmem:[%s3233_s3 + $0x39] sm:$0x1]  ;;  %v2953_v48 = vld [vmem:[%s3233_s3 + $0x3a] ss:$0 sm:$0xff]  ;;  %v36_v52 = vld [vmem:[%s3234_s4] sm:$0xff]  ;;  %vm507_vm11 = vcmask 44032  }
   0xa   :  { %v2946_v43 = vsub.s32 0, %v304_v41  ;;  %v37_v53 = vld [vmem:[%s3234_s4 + $0x8] sm:$0xff]  ;;  %v39_v56 = vld [vmem:[%s3234_s4 + $0x18] sm:$0xff]  ;;  %v2315_v58 = vld [vmem:[%s3231_s1 + $0x4] sm:$0xf] }
   0xb   :  { %2446 = vmatmul.mubr.msk.f32.vlgmr.msra.gmra.mrb[0].mxu0 %vm120_vm6, %v41_v7  ;;  %2637 = vmatpush3.bf16.msra.mxu1 %v2925_v13  ;;  %v2965_v54 = vpack.c.bf16 %v37_v53, %v36_v52  ;;  %v2975_v57 = vpack.c.bf16 %v39_v56, %v38_v55 }
   0xc   :  { %2449 = vmatpush3.msk.msra.mxu0 %vm202_vm7, %v2903_v9  ;;  %2450 = vmatprep.mubr.msk.f32.mxu0 %vm2818_vm1, %v2817_v2 }
   0xd   :  { %2475 = vmatprep.subr.mxu0 %v2817_v2  ;;  %2638 = vmatprep.subr.bf16.mxu1 %v2820_v8 }
   0xf   :  { %2640 = vmatpush3.bf16.msra.mxu1 %v2935_v16 }
  0x10   :  { %2641 = vmatprep.subr.bf16.mxu1 %v2820_v8 }
  0x13   :  { %2451 = vmatmul.mubr.msk.f32.vlgmr.msra.gmra.mrb[0].mxu0 %vm198_vm8, %v45_v10 }
  0x14   :  { %2476 = vmatpush3.msra.mxu0 %v2864_v0  ;;  %2477 = vmatprep.mubr.msk.f32.mxu0 %vm2818_vm1, %v2817_v2 }
  0x15   :  { %2647 = vmatprep.subr.bf16.mxu0 %v2820_v8 }
  0x17   :  { %2478 = vmatmul.mubr.msk.f32.vlgmr.msra.gmra.mrb[2].mxu0 %vm46_vm0, %v2315_v58 }
  0x18   :  { %2650 = vmatpush3.bf16.msk.msra.mxu0 %vm2881_vm4, %v2879_v5  ;;  %2484 = vmatprep.mubr.msk.f32.mxu0 %vm2818_vm1, %v2817_v2 }
  0x19   :  { %2487 = vmatprep.subr.mxu0 %v2817_v2 }
  0xe6   :  { %v272_v17 = vpop.f32.mrb[0].mxu0 }
  0xe7   :  { %v278_v18 = vsel %vm277_vm9, %v272_v17, 0.0  ;;  %v287_v19 = vmul.f32 %v272_v17, %v272_v17  ;;  %v2452_v20 = vpop.f32.mrb[1].mxu0 }
  0xe8   :  { %v279_v21 = vrot.slane %v278_v18, 4 }
  0xe9   :  { %v288_v22 = vsel %vm277_vm9, %v287_v19, 0.0 }
  0xea   :  { %v280_v23 = vadd.f32 %v279_v21, %v278_v18  ;;  %v289_v24 = vrot.slane %v288_v22, 4 }
  0xec   :  { %v281_v25 = vrot.slane %v280_v23, 2  ;;  %v290_v26 = vadd.f32 %v289_v24, %v288_v22 }
  0xee   :  { %v282_v27 = vadd.f32 %v281_v25, %v280_v23  ;;  %v291_v28 = vrot.slane %v290_v26, 2 }
  0xf0   :  { %v283_v29 = vrot.slane %v282_v27, 1  ;;  %v292_v30 = vadd.f32 %v291_v28, %v290_v26  ;;  %v2994_v26 = vld [vmem:[%s3233_s3 + $0x3b] sm:$0x1] }
  0xf2   :  { %v284_v31 = vadd.f32 %v283_v29, %v282_v27  ;;  %v293_v32 = vrot.slane %v292_v30, 1 }
  0xf4   :  { %v286_v33 = vmul.f32 0.25, %v284_v31  ;;  %v294_v34 = vadd.f32 %v293_v32, %v292_v30  ;;  %v3001_v31 = vld [vmem:[%s3233_s3 + $0x3c] ss:$0 sm:$0xff] }
  0xf6   :  { %v295_v35 = vmul.f32 0.25, %v294_v34  ;;  %v296_v36 = vmul.f32 %v286_v33, %v286_v33  ;;  %v302_v46 = vsub.f32 %v272_v17, %v286_v33 }
  0xf8   :  { %v297_v37 = vsub.f32 %v295_v35, %v296_v36  ;;  %v3014_v35 = vld [vmem:[%s3234_s4 + $0x20] ss:$0 sm:$0xff] }
  0xfa   :  { %v298_v38 = vmax.f32 %v297_v37, 0.0 }
  0xfc   :  { %v299_v39 = vadd.f32 1e-05, %v298_v38 }
  0xfe   :  { %2739 = vrsqrt.f32 %v299_v39  ;;  %v2316_v39 = vld [vmem:[%s3232_s2 + $0x4] sm:$0xf] }
 0x108   :  { %v2740_v44 = vpop.eup %2739 }
 0x109   :  { %v301_v45 = vmul.f32 %v2740_v44, %v2944_v42 }
 0x10b   :  { %v306_v47 = vrot.slane %v301_v45, %v2946_v43 }
 0x10d   :  { %v307_v49 = vmul.f32 %v306_v47, %v302_v46 }
 0x10f   :  { %v312_v50 = vadd.f32 %v2953_v48, %v307_v49 }
 0x111   :  { %v313_v51 = vmax.f32 %v312_v50, 0.0 }
 0x113   :  { %2462 = vmatmul.mubr.msk.f32.vlgmr.msra.gmra.mrb[0].mxu1 %vm314_vm10, %v313_v51 }
 0x114   :  { %2472 = vmatprep.mubr.msk.f32.mxu1 %vm2818_vm1, %v2817_v2  ;;  %2643 = vmatpush3.bf16.msra.mxu1 %v2965_v54 }
 0x115   :  { %2644 = vmatprep.subr.bf16.mxu1 %v2820_v8 }
 0x118   :  { %2646 = vmatpush3.bf16.msra.mxu1 %v2975_v57 }
 0x119   :  { %2651 = vmatprep.subr.bf16.mxu1 %v2820_v8 }
 0x1e6   :  { %v384_v59 = vpop.f32.mrb[0].mxu1 }
 0x1e7   :  { %v388_v60 = vsel %vm277_vm9, %v384_v59, 0.0  ;;  %v396_v61 = vmul.f32 %v384_v59, %v384_v59  ;;  %v2463_v62 = vpop.f32.mrb[1].mxu1 }
 0x1e8   :  { %v389_v63 = vrot.slane %v388_v60, 4 }
 0x1e9   :  { %v397_v1 = vsel %vm277_vm9, %v396_v61, 0.0 }
 0x1ea   :  { %v390_v3 = vadd.f32 %v389_v63, %v388_v60  ;;  %v398_v4 = vrot.slane %v397_v1, 4 }
 0x1ec   :  { %v391_v7 = vrot.slane %v390_v3, 2  ;;  %v399_v10 = vadd.f32 %v398_v4, %v397_v1 }
 0x1ee   :  { %v392_v11 = vadd.f32 %v391_v7, %v390_v3  ;;  %v400_v12 = vrot.slane %v399_v10, 2 }
 0x1f0   :  { %v393_v14 = vrot.slane %v392_v11, 1  ;;  %v401_v15 = vadd.f32 %v400_v12, %v399_v10 }
 0x1f2   :  { %v394_v17 = vadd.f32 %v393_v14, %v392_v11  ;;  %v402_v18 = vrot.slane %v401_v15, 1 }
 0x1f4   :  { %v395_v19 = vmul.f32 0.25, %v394_v17  ;;  %v403_v20 = vadd.f32 %v402_v18, %v401_v15 }
 0x1f6   :  { %v404_v21 = vmul.f32 0.25, %v403_v20  ;;  %v405_v22 = vmul.f32 %v395_v19, %v395_v19  ;;  %v411_v29 = vsub.f32 %v384_v59, %v395_v19 }
 0x1f8   :  { %v406_v23 = vsub.f32 %v404_v21, %v405_v22 }
 0x1fa   :  { %v407_v24 = vmax.f32 %v406_v23, 0.0 }
 0x1fc   :  { %v408_v25 = vadd.f32 1e-05, %v407_v24 }
 0x1fe   :  { %2741 = vrsqrt.f32 %v408_v25 }
 0x208   :  { %v2742_v27 = vpop.eup %2741 }
 0x209   :  { %v410_v28 = vmul.f32 %v2742_v27, %v2994_v26 }
 0x20b   :  { %v415_v30 = vrot.slane %v410_v28, %v2946_v43 }
 0x20d   :  { %v416_v32 = vmul.f32 %v415_v30, %v411_v29 }
 0x20f   :  { %v421_v33 = vadd.f32 %v3001_v31, %v416_v32 }
 0x211   :  { %v422_v34 = vmax.f32 %v421_v33, 0.0 }
 0x213   :  { %2473 = vmatmul.mubr.msk.f32.vlgmr.msra.gmra.mrb[2].mxu1 %vm314_vm10, %v422_v34 }
 0x214   :  { %2653 = vmatpush3.bf16.msra.mxu1 %v2925_v13  ;;  %2500 = vmatprep.mubr.msk.f32.mxu1 %vm2818_vm1, %v2817_v2 }
 0x215   :  { %2654 = vmatprep.subr.bf16.mxu1 %v2820_v8 }
 0x218   :  { %2656 = vmatpush3.bf16.msra.mxu1 %v2935_v16 }
 0x219   :  { %2663 = vmatprep.subr.bf16.mxu1 %v2820_v8 }
 0x2e6   :  { %v496_v36 = vpop.f32.mrb[2].mxu1 }
 0x2e7   :  { %v497_v37 = vadd.f32 %v3014_v35, %v496_v36  ;;  %v2474_v38 = vpop.f32.mrb[3].mxu1 }
 0x2e9   :  { %501 = vst.msk [vmem:[#allocation2 + $0x4] sm:$0xf] %vm42_vm5, %v497_v37  ;;  %2743 = vtanh.f32 %v497_v37  ;;  %2485 = vmatmul.mubr.msk.f32.vlgmr.msra.gmra.mrb[2].mxu0 %vm120_vm6, %v497_v37 }
 0x2ea   :  { %2488 = vmatpush3.msk.msra.mxu0 %vm202_vm7, %v2903_v9  ;;  %2489 = vmatprep.mubr.msk.f32.mxu0 %vm2818_vm1, %v2817_v2 }
 0x2eb   :  { %2657 = vmatprep.subr.bf16.mxu0 %v2820_v8 }
 0x2f1   :  { %2490 = vmatmul.mubr.msk.f32.vlgmr.msra.gmra.mrb[2].mxu0 %vm198_vm8, %v2316_v39 }
 0x2f2   :  { %2659 = vmatpush3.bf16.msra.mxu0 %v2965_v54  ;;  %2511 = vmatprep.mubr.msk.f32.mxu0 %vm2818_vm1, %v2817_v2 }
 0x2f3   :  { %v2744_v40 = vpop.eup %2743  ;;  %2660 = vmatprep.subr.bf16.mxu0 %v2820_v8 }
 0x2f4   :  { %504 = vrot.lane.b32.xlu0 %v2744_v40, %s2821_s13 }
 0x2f6   :  { %2662 = vmatpush3.bf16.msra.mxu0 %v2975_v57 }
 0x2f7   :  { %2514 = vmatprep.subr.mxu0 %v2817_v2 }
 0x366   :  { %v505_v41 = vpop.permute.xlu0 %504 }
 0x367   :  { %508 = vst.msk [vmem:[#allocation4] sm:$0xf] %vm507_vm11, %v505_v41 }
 0x3c4   :  { %v728_v44 = vpop.f32.mrb[2].mxu0 }
 0x3c5   :  { %v733_v45 = vsel %vm277_vm9, %v728_v44, 0.0  ;;  %v741_v46 = vmul.f32 %v728_v44, %v728_v44  ;;  %v2491_v47 = vpop.f32.mrb[3].mxu0 }
 0x3c6   :  { %v734_v49 = vrot.slane %v733_v45, 4 }
 0x3c7   :  { %v742_v50 = vsel %vm277_vm9, %v741_v46, 0.0 }
 0x3c8   :  { %v735_v51 = vadd.f32 %v734_v49, %v733_v45  ;;  %v743_v52 = vrot.slane %v742_v50, 4 }
 0x3ca   :  { %v736_v53 = vrot.slane %v735_v51, 2  ;;  %v744_v55 = vadd.f32 %v743_v52, %v742_v50 }
 0x3cc   :  { %v737_v56 = vadd.f32 %v736_v53, %v735_v51  ;;  %v745_v58 = vrot.slane %v744_v55, 2 }
 0x3ce   :  { %v738_v59 = vrot.slane %v737_v56, 1  ;;  %v746_v60 = vadd.f32 %v745_v58, %v744_v55 }
 0x3d0   :  { %v739_v61 = vadd.f32 %v738_v59, %v737_v56  ;;  %v747_v62 = vrot.slane %v746_v60, 1  ;;  %v2324_v59 = vld [vmem:[%s3231_s1 + $0x8] sm:$0xf] }
 0x3d2   :  { %v740_v63 = vmul.f32 0.25, %v739_v61  ;;  %v748_v1 = vadd.f32 %v747_v62, %v746_v60 }
 0x3d4   :  { %v749_v3 = vmul.f32 0.25, %v748_v1  ;;  %v750_v4 = vmul.f32 %v740_v63, %v740_v63  ;;  %v756_v15 = vsub.f32 %v728_v44, %v740_v63  ;;  %v2325_v63 = vld [vmem:[%s3232_s2 + $0x8] sm:$0xf] }
 0x3d6   :  { %v751_v7 = vsub.f32 %v749_v3, %v750_v4 }
 0x3d8   :  { %v752_v10 = vmax.f32 %v751_v7, 0.0 }
 0x3da   :  { %v753_v11 = vadd.f32 1e-05, %v752_v10 }
 0x3dc   :  { %2745 = vrsqrt.f32 %v753_v11 }
 0x3e6   :  { %v2746_v12 = vpop.eup %2745 }
 0x3e7   :  { %v755_v14 = vmul.f32 %v2746_v12, %v2944_v42 }
 0x3e9   :  { %v760_v17 = vrot.slane %v755_v14, %v2946_v43 }
 0x3eb   :  { %v761_v18 = vmul.f32 %v760_v17, %v756_v15 }
 0x3ed   :  { %v762_v19 = vadd.f32 %v2953_v48, %v761_v18 }
 0x3ef   :  { %v763_v20 = vmax.f32 %v762_v19, 0.0 }
 0x3f1   :  { %2501 = vmatmul.mubr.msk.f32.vlgmr.msra.gmra.mrb[4].mxu1 %vm314_vm10, %v763_v20 }
 0x3f2   :  { %2666 = vmatpush3.bf16.msk.msra.mxu1 %vm2881_vm4, %v2879_v5  ;;  %2523 = vmatprep.mubr.msk.f32.mxu1 %vm2818_vm1, %v2817_v2 }
 0x3f3   :  { %2526 = vmatprep.subr.mxu1 %v2817_v2 }
 0x4c4   :  { %v833_v21 = vpop.f32.mrb[4].mxu1 }
 0x4c5   :  { %v837_v22 = vsel %vm277_vm9, %v833_v21, 0.0  ;;  %v845_v23 = vmul.f32 %v833_v21, %v833_v21  ;;  %v2502_v24 = vpop.f32.mrb[5].mxu1 }
 0x4c6   :  { %v838_v25 = vrot.slane %v837_v22, 4 }
 0x4c7   :  { %v846_v27 = vsel %vm277_vm9, %v845_v23, 0.0 }
 0x4c8   :  { %v839_v28 = vadd.f32 %v838_v25, %v837_v22  ;;  %v847_v29 = vrot.slane %v846_v27, 4 }
 0x4ca   :  { %v840_v30 = vrot.slane %v839_v28, 2  ;;  %v848_v32 = vadd.f32 %v847_v29, %v846_v27 }
 0x4cc   :  { %v841_v33 = vadd.f32 %v840_v30, %v839_v28  ;;  %v849_v34 = vrot.slane %v848_v32, 2 }
 0x4ce   :  { %v842_v36 = vrot.slane %v841_v33, 1  ;;  %v850_v37 = vadd.f32 %v849_v34, %v848_v32 }
 0x4d0   :  { %v843_v38 = vadd.f32 %v842_v36, %v841_v33  ;;  %v851_v39 = vrot.slane %v850_v37, 1 }
 0x4d2   :  { %v844_v40 = vmul.f32 0.25, %v843_v38  ;;  %v852_v41 = vadd.f32 %v851_v39, %v850_v37 }
 0x4d4   :  { %v853_v44 = vmul.f32 0.25, %v852_v41  ;;  %v854_v45 = vmul.f32 %v844_v40, %v844_v40  ;;  %v860_v52 = vsub.f32 %v833_v21, %v844_v40 }
 0x4d6   :  { %v855_v46 = vsub.f32 %v853_v44, %v854_v45 }
 0x4d8   :  { %v856_v47 = vmax.f32 %v855_v46, 0.0 }
 0x4da   :  { %v857_v49 = vadd.f32 1e-05, %v856_v47 }
 0x4dc   :  { %2747 = vrsqrt.f32 %v857_v49  ;;  %v2333_v49 = vld [vmem:[%s3231_s1 + $0xc] sm:$0xf] }
 0x4e6   :  { %v2748_v50 = vpop.eup %2747 }
 0x4e7   :  { %v859_v51 = vmul.f32 %v2748_v50, %v2994_v26 }
 0x4e9   :  { %v864_v53 = vrot.slane %v859_v51, %v2946_v43 }
 0x4eb   :  { %v865_v55 = vmul.f32 %v864_v53, %v860_v52 }
 0x4ed   :  { %v866_v56 = vadd.f32 %v3001_v31, %v865_v55 }
 0x4ef   :  { %v867_v58 = vmax.f32 %v866_v56, 0.0 }
 0x4f1   :  { %2512 = vmatmul.mubr.msk.f32.vlgmr.msra.gmra.mrb[4].mxu0 %vm314_vm10, %v867_v58 }
 0x4f2   :  { %2515 = vmatpush3.msra.mxu0 %v2864_v0  ;;  %2516 = vmatprep.mubr.msk.f32.mxu0 %vm2818_vm1, %v2817_v2 }
 0x4f3   :  { %2667 = vmatprep.subr.bf16.mxu0 %v2820_v8 }
 0x4f5   :  { %2517 = vmatmul.mubr.msk.f32.vlgmr.msra.gmra.mrb[6].mxu0 %vm46_vm0, %v2324_v59 }
 0x4f6   :  { %2669 = vmatpush3.bf16.msra.mxu0 %v2925_v13  ;;  %2539 = vmatprep.mubr.msk.f32.mxu0 %vm2818_vm1, %v2817_v2 }
 0x4f7   :  { %2670 = vmatprep.subr.bf16.mxu0 %v2820_v8 }
 0x4fa   :  { %2672 = vmatpush3.bf16.msra.mxu0 %v2935_v16 }
 0x4fb   :  { %2553 = vmatprep.subr.mxu0 %v2817_v2 }
 0x5c4   :  { %v937_v60 = vpop.f32.mrb[4].mxu0 }
 0x5c5   :  { %v938_v61 = vadd.f32 %v3014_v35, %v937_v60  ;;  %v2513_v62 = vpop.f32.mrb[5].mxu0 }
 0x5c7   :  { %942 = vst.msk [vmem:[#allocation2 + $0x8] sm:$0xf] %vm42_vm5, %v938_v61  ;;  %2749 = vtanh.f32 %v938_v61  ;;  %2524 = vmatmul.mubr.msk.f32.vlgmr.msra.gmra.mrb[6].mxu1 %vm120_vm6, %v938_v61 }
 0x5c8   :  { %2527 = vmatpush3.msk.msra.mxu1 %vm202_vm7, %v2903_v9  ;;  %2528 = vmatprep.mubr.msk.f32.mxu1 %vm2818_vm1, %v2817_v2  ;;  %v1023_v3 = vpop.f32.mrb[6].mxu0 }
 0x5c9   :  { %2673 = vmatprep.subr.bf16.mxu1 %v2820_v8  ;;  %v2518_v4 = vpop.f32.mrb[7].mxu0 }
 0x5cf   :  { %2529 = vmatmul.mubr.msk.f32.vlgmr.msra.gmra.mrb[6].mxu1 %vm198_vm8, %v2325_v63 }
 0x5d0   :  { %2675 = vmatpush3.bf16.msra.mxu1 %v2965_v54  ;;  %2550 = vmatprep.mubr.msk.f32.mxu1 %vm2818_vm1, %v2817_v2 }
 0x5d1   :  { %v2750_v1 = vpop.eup %2749  ;;  %2676 = vmatprep.subr.bf16.mxu1 %v2820_v8 }
 0x5d2   :  { %945 = vrot.lane.b32.xlu0 %v2750_v1, %s2821_s13 }
 0x5d4   :  { %2678 = vmatpush3.bf16.msra.mxu1 %v2975_v57 }
 0x5d5   :  { %2683 = vmatprep.subr.bf16.mxu1 %v2820_v8 }
 0x644   :  { %v946_v7 = vpop.permute.xlu0 %945 }
 0x645   :  { %949 = vst.msk [vmem:[#allocation4 + $0x4] sm:$0xf] %vm507_vm11, %v946_v7 }
 0x6a2   :  { %v1169_v10 = vpop.f32.mrb[6].mxu1 }
 0x6a3   :  { %v2711_v11 = vadd.f32 %v1169_v10, %v1023_v3  ;;  %v2530_v12 = vpop.f32.mrb[7].mxu1 }
 0x6a5   :  { %v1174_v14 = vsel %vm277_vm9, %v2711_v11, 0.0  ;;  %v1182_v15 = vmul.f32 %v2711_v11, %v2711_v11 }
 0x6a6   :  { %v1175_v17 = vrot.slane %v1174_v14, 4 }
 0x6a7   :  { %v1183_v18 = vsel %vm277_vm9, %v1182_v15, 0.0 }
 0x6a8   :  { %v1176_v19 = vadd.f32 %v1175_v17, %v1174_v14  ;;  %v1184_v20 = vrot.slane %v1183_v18, 4 }
 0x6aa   :  { %v1177_v21 = vrot.slane %v1176_v19, 2  ;;  %v1185_v22 = vadd.f32 %v1184_v20, %v1183_v18 }
 0x6ac   :  { %v1178_v23 = vadd.f32 %v1177_v21, %v1176_v19  ;;  %v1186_v24 = vrot.slane %v1185_v22, 2 }
 0x6ae   :  { %v1179_v25 = vrot.slane %v1178_v23, 1  ;;  %v1187_v27 = vadd.f32 %v1186_v24, %v1185_v22 }
 0x6b0   :  { %v1180_v28 = vadd.f32 %v1179_v25, %v1178_v23  ;;  %v1188_v29 = vrot.slane %v1187_v27, 1 }
 0x6b2   :  { %v1181_v30 = vmul.f32 0.25, %v1180_v28  ;;  %v1189_v32 = vadd.f32 %v1188_v29, %v1187_v27 }
 0x6b4   :  { %v1190_v33 = vmul.f32 0.25, %v1189_v32  ;;  %v1191_v34 = vmul.f32 %v1181_v30, %v1181_v30  ;;  %v1197_v41 = vsub.f32 %v2711_v11, %v1181_v30  ;;  %v2334_v30 = vld [vmem:[%s3232_s2 + $0xc] sm:$0xf] }
 0x6b6   :  { %v1192_v36 = vsub.f32 %v1190_v33, %v1191_v34 }
 0x6b8   :  { %v1193_v37 = vmax.f32 %v1192_v36, 0.0 }
 0x6ba   :  { %v1194_v38 = vadd.f32 1e-05, %v1193_v37 }
 0x6bc   :  { %2751 = vrsqrt.f32 %v1194_v38 }
 0x6c6   :  { %v2752_v39 = vpop.eup %2751 }
 0x6c7   :  { %v1196_v40 = vmul.f32 %v2752_v39, %v2944_v42 }
 0x6c9   :  { %v1201_v44 = vrot.slane %v1196_v40, %v2946_v43 }
 0x6cb   :  { %v1202_v45 = vmul.f32 %v1201_v44, %v1197_v41 }
 0x6cd   :  { %v1203_v46 = vadd.f32 %v2953_v48, %v1202_v45 }
 0x6cf   :  { %v1204_v47 = vmax.f32 %v1203_v46, 0.0 }
 0x6d1   :  { %2540 = vmatmul.mubr.msk.f32.vlgmr.msra.gmra.mrb[8].mxu0 %vm314_vm10, %v1204_v47 }
 0x6d2   :  { %2554 = vmatpush3.msra.mxu0 %v2864_v0  ;;  %2555 = vmatprep.mubr.msk.f32.mxu0 %vm2818_vm1, %v2817_v2 }
 0x6d3   :  { %2679 = vmatprep.subr.bf16.mxu0 %v2820_v8 }
 0x6d5   :  { %2556 = vmatmul.mubr.msk.f32.vlgmr.msra.gmra.mrb[10].mxu0 %vm46_vm0, %v2333_v49 }
 0x6d6   :  { %2682 = vmatpush3.bf16.msk.msra.mxu0 %vm2881_vm4, %v2879_v5  ;;  %2562 = vmatprep.mubr.msk.f32.mxu0 %vm2818_vm1, %v2817_v2 }
 0x6d7   :  { %2565 = vmatprep.subr.mxu0 %v2817_v2 }
 0x7a4   :  { %v1274_v50 = vpop.f32.mrb[8].mxu0 }
 0x7a5   :  { %v1278_v51 = vsel %vm277_vm9, %v1274_v50, 0.0  ;;  %v1286_v52 = vmul.f32 %v1274_v50, %v1274_v50  ;;  %v2541_v53 = vpop.f32.mrb[9].mxu0 }
 0x7a6   :  { %v1279_v55 = vrot.slane %v1278_v51, 4 }
 0x7a7   :  { %v1287_v56 = vsel %vm277_vm9, %v1286_v52, 0.0 }
 0x7a8   :  { %v1280_v58 = vadd.f32 %v1279_v55, %v1278_v51  ;;  %v1288_v59 = vrot.slane %v1287_v56, 4 }
 0x7aa   :  { %v1281_v60 = vrot.slane %v1280_v58, 2  ;;  %v1289_v61 = vadd.f32 %v1288_v59, %v1287_v56 }
 0x7ac   :  { %v1282_v62 = vadd.f32 %v1281_v60, %v1280_v58  ;;  %v1290_v63 = vrot.slane %v1289_v61, 2 }
 0x7ae   :  { %v1283_v1 = vrot.slane %v1282_v62, 1  ;;  %v1291_v3 = vadd.f32 %v1290_v63, %v1289_v61 }
 0x7b0   :  { %v1284_v4 = vadd.f32 %v1283_v1, %v1282_v62  ;;  %v1292_v7 = vrot.slane %v1291_v3, 1 }
 0x7b2   :  { %v1285_v10 = vmul.f32 0.25, %v1284_v4  ;;  %v1293_v11 = vadd.f32 %v1292_v7, %v1291_v3 }
 0x7b4   :  { %v1294_v12 = vmul.f32 0.25, %v1293_v11  ;;  %v1295_v14 = vmul.f32 %v1285_v10, %v1285_v10  ;;  %v1301_v21 = vsub.f32 %v1274_v50, %v1285_v10 }
 0x7b6   :  { %v1296_v15 = vsub.f32 %v1294_v12, %v1295_v14  ;;  %v2342_v12 = vld [vmem:[%s3231_s1 + $0x10] sm:$0xf] }
 0x7b8   :  { %v1297_v17 = vmax.f32 %v1296_v15, 0.0 }
 0x7ba   :  { %v1298_v18 = vadd.f32 1e-05, %v1297_v17 }
 0x7bc   :  { %2753 = vrsqrt.f32 %v1298_v18 }
 0x7c6   :  { %v2754_v19 = vpop.eup %2753 }
 0x7c7   :  { %v1300_v20 = vmul.f32 %v2754_v19, %v2994_v26 }
 0x7c9   :  { %v1305_v22 = vrot.slane %v1300_v20, %v2946_v43 }
 0x7cb   :  { %v1306_v23 = vmul.f32 %v1305_v22, %v1301_v21 }
 0x7cd   :  { %v1307_v24 = vadd.f32 %v3001_v31, %v1306_v23 }
 0x7cf   :  { %v1308_v25 = vmax.f32 %v1307_v24, 0.0 }
 0x7d1   :  { %2551 = vmatmul.mubr.msk.f32.vlgmr.msra.gmra.mrb[8].mxu1 %vm314_vm10, %v1308_v25 }
 0x7d2   :  { %2685 = vmatpush3.bf16.msra.mxu1 %v2925_v13  ;;  %2578 = vmatprep.mubr.msk.f32.mxu1 %vm2818_vm1, %v2817_v2 }
 0x7d3   :  { %2686 = vmatprep.subr.bf16.mxu1 %v2820_v8 }
 0x7d6   :  { %2688 = vmatpush3.bf16.msra.mxu1 %v2935_v16 }
 0x7d7   :  { %2592 = vmatprep.subr.mxu1 %v2817_v2 }
 0x8a4   :  { %v1378_v27 = vpop.f32.mrb[8].mxu1 }
 0x8a5   :  { %v1379_v28 = vadd.f32 %v3014_v35, %v1378_v27  ;;  %v2552_v29 = vpop.f32.mrb[9].mxu1 }
 0x8a7   :  { %1383 = vst.msk [vmem:[#allocation2 + $0xc] sm:$0xf] %vm42_vm5, %v1379_v28  ;;  %2755 = vtanh.f32 %v1379_v28  ;;  %2563 = vmatmul.mubr.msk.f32.vlgmr.msra.gmra.mrb[10].mxu0 %vm120_vm6, %v1379_v28 }
 0x8a8   :  { %2566 = vmatpush3.msk.msra.mxu0 %vm202_vm7, %v2903_v9  ;;  %2567 = vmatprep.mubr.msk.f32.mxu0 %vm2818_vm1, %v2817_v2 }
 0x8a9   :  { %2689 = vmatprep.subr.bf16.mxu0 %v2820_v8 }
 0x8af   :  { %2568 = vmatmul.mubr.msk.f32.vlgmr.msra.gmra.mrb[10].mxu0 %vm198_vm8, %v2334_v30 }
 0x8b0   :  { %2691 = vmatpush3.bf16.msra.mxu0 %v2965_v54  ;;  %2589 = vmatprep.mubr.msk.f32.mxu0 %vm2818_vm1, %v2817_v2 }
 0x8b1   :  { %v2756_v32 = vpop.eup %2755  ;;  %2692 = vmatprep.subr.bf16.mxu0 %v2820_v8 }
 0x8b2   :  { %1386 = vrot.lane.b32.xlu1 %v2756_v32, %s2821_s13 }
 0x8b4   :  { %2694 = vmatpush3.bf16.msra.mxu0 %v2975_v57 }
 0x8b5   :  { %2699 = vmatprep.subr.bf16.mxu0 %v2820_v8 }
 0x924   :  { %v1387_v33 = vpop.permute.xlu1 %1386 }
 0x925   :  { %1390 = vst.msk [vmem:[#allocation4 + $0x8] sm:$0xf] %vm507_vm11, %v1387_v33 }
 0x982   :  { %v1610_v34 = vpop.f32.mrb[10].mxu0 }
 0x983   :  { %v1615_v36 = vsel %vm277_vm9, %v1610_v34, 0.0  ;;  %v1623_v37 = vmul.f32 %v1610_v34, %v1610_v34  ;;  %v2569_v38 = vpop.f32.mrb[11].mxu0 }
 0x984   :  { %v1616_v39 = vrot.slane %v1615_v36, 4 }
 0x985   :  { %v1624_v40 = vsel %vm277_vm9, %v1623_v37, 0.0 }
 0x986   :  { %v1617_v41 = vadd.f32 %v1616_v39, %v1615_v36  ;;  %v1625_v44 = vrot.slane %v1624_v40, 4 }
 0x988   :  { %v1618_v45 = vrot.slane %v1617_v41, 2  ;;  %v1626_v46 = vadd.f32 %v1625_v44, %v1624_v40 }
 0x98a   :  { %v1619_v47 = vadd.f32 %v1618_v45, %v1617_v41  ;;  %v1627_v49 = vrot.slane %v1626_v46, 2 }
 0x98c   :  { %v1620_v50 = vrot.slane %v1619_v47, 1  ;;  %v1628_v51 = vadd.f32 %v1627_v49, %v1626_v46 }
 0x98e   :  { %v1621_v52 = vadd.f32 %v1620_v50, %v1619_v47  ;;  %v1629_v53 = vrot.slane %v1628_v51, 1 }
 0x990   :  { %v1622_v55 = vmul.f32 0.25, %v1621_v52  ;;  %v1630_v56 = vadd.f32 %v1629_v53, %v1628_v51 }
 0x992   :  { %v1631_v58 = vmul.f32 0.25, %v1630_v56  ;;  %v1632_v59 = vmul.f32 %v1622_v55, %v1622_v55  ;;  %v1638_v3 = vsub.f32 %v1610_v34, %v1622_v55 }
 0x994   :  { %v1633_v60 = vsub.f32 %v1631_v58, %v1632_v59 }
 0x996   :  { %v1634_v61 = vmax.f32 %v1633_v60, 0.0 }
 0x998   :  { %v1635_v62 = vadd.f32 1e-05, %v1634_v61 }
 0x99a   :  { %2757 = vrsqrt.f32 %v1635_v62 }
 0x9a4   :  { %v2758_v63 = vpop.eup %2757 }
 0x9a5   :  { %v1637_v1 = vmul.f32 %v2758_v63, %v2944_v42 }
 0x9a7   :  { %v1642_v4 = vrot.slane %v1637_v1, %v2946_v43 }
 0x9a9   :  { %v1643_v7 = vmul.f32 %v1642_v4, %v1638_v3 }
 0x9ab   :  { %v1644_v10 = vadd.f32 %v2953_v48, %v1643_v7 }
 0x9ad   :  { %v1645_v11 = vmax.f32 %v1644_v10, 0.0 }
 0x9af   :  { %2579 = vmatmul.mubr.msk.f32.vlgmr.msra.gmra.mrb[10].mxu1 %vm314_vm10, %v1645_v11 }
 0x9b0   :  { %2593 = vmatpush3.msra.mxu1 %v2864_v0  ;;  %2594 = vmatprep.mubr.msk.f32.mxu1 %vm2818_vm1, %v2817_v2 }
 0x9b1   :  { %2695 = vmatprep.subr.bf16.mxu1 %v2820_v8 }
 0x9b3   :  { %2595 = vmatmul.mubr.msk.f32.vlgmr.msra.gmra.mrb[12].mxu1 %vm46_vm0, %v2342_v12 }
 0x9b4   :  { %2698 = vmatpush3.bf16.msk.msra.mxu1 %vm2881_vm4, %v2879_v5  ;;  %2601 = vmatprep.mubr.msk.f32.mxu1 %vm2818_vm1, %v2817_v2 }
 0x9b5   :  { %2604 = vmatprep.subr.mxu1 %v2817_v2 }
 0xa82   :  { %v1715_v0 = vpop.f32.mrb[10].mxu1 }
 0xa83   :  { %v1719_v14 = vsel %vm277_vm9, %v1715_v0, 0.0  ;;  %v1727_v15 = vmul.f32 %v1715_v0, %v1715_v0  ;;  %v2580_v17 = vpop.f32.mrb[11].mxu1 }
 0xa84   :  { %v1720_v18 = vrot.slane %v1719_v14, 4 }
 0xa85   :  { %v1728_v19 = vsel %vm277_vm9, %v1727_v15, 0.0 }
 0xa86   :  { %v1721_v20 = vadd.f32 %v1720_v18, %v1719_v14  ;;  %v1729_v21 = vrot.slane %v1728_v19, 4 }
 0xa88   :  { %v1722_v22 = vrot.slane %v1721_v20, 2  ;;  %v1730_v23 = vadd.f32 %v1729_v21, %v1728_v19 }
 0xa8a   :  { %v1723_v24 = vadd.f32 %v1722_v22, %v1721_v20  ;;  %v1731_v6 = vrot.slane %v1730_v23, 2 }
 0xa8c   :  { %v1724_v5 = vrot.slane %v1723_v24, 1  ;;  %v1732_v25 = vadd.f32 %v1731_v6, %v1730_v23 }
 0xa8e   :  { %v1725_v27 = vadd.f32 %v1724_v5, %v1723_v24  ;;  %v1733_v28 = vrot.slane %v1732_v25, 1 }
 0xa90   :  { %v1726_v29 = vmul.f32 0.25, %v1725_v27  ;;  %v1734_v30 = vadd.f32 %v1733_v28, %v1732_v25 }
 0xa92   :  { %v1735_v32 = vmul.f32 0.25, %v1734_v30  ;;  %v1736_v33 = vmul.f32 %v1726_v29, %v1726_v29  ;;  %v1742_v40 = vsub.f32 %v1715_v0, %v1726_v29 }
 0xa94   :  { %v1737_v34 = vsub.f32 %v1735_v32, %v1736_v33 }
 0xa96   :  { %v1738_v36 = vmax.f32 %v1737_v34, 0.0 }
 0xa98   :  { %v1739_v37 = vadd.f32 1e-05, %v1738_v36 }
 0xa9a   :  { %2759 = vrsqrt.f32 %v1739_v37 }
 0xaa4   :  { %v2760_v38 = vpop.eup %2759 }
 0xaa5   :  { %v1741_v39 = vmul.f32 %v2760_v38, %v2994_v26 }
 0xaa7   :  { %v1746_v41 = vrot.slane %v1741_v39, %v2946_v43 }
 0xaa9   :  { %v1747_v44 = vmul.f32 %v1746_v41, %v1742_v40 }
 0xaab   :  { %v1748_v45 = vadd.f32 %v3001_v31, %v1747_v44 }
 0xaad   :  { %v1749_v46 = vmax.f32 %v1748_v45, 0.0 }
 0xaaf   :  { %2590 = vmatmul.mubr.msk.f32.vlgmr.msra.gmra.mrb[12].mxu0 %vm314_vm10, %v1749_v46 }
 0xab0   :  { %2701 = vmatpush3.bf16.msra.mxu0 %v2925_v13  ;;  %2617 = vmatprep.mubr.msk.f32.mxu0 %vm2818_vm1, %v2817_v2  ;;  %v2343_v13 = vld [vmem:[%s3232_s2 + $0x10] sm:$0xf]  ;;  %s2822_s2 = smov [#allocation2]  }
 0xab1   :  { %2702 = vmatprep.subr.bf16.mxu0 %v2820_v8  ;;  %s2278_s25 = sshll.u32 %s2822_s2, 4  ;;  %s2279_s25 = int_to_ptr.vmem [resolvable:$true] %s2278_s25 }
 0xab2   :  { %s2769_s26 = scalar_lea.vmem %s2279_s25, 384  ;;  %p2774_p1 = scmp.lt.s32.totalorder %s2279_s25, %s2279_s25 }
 0xab3   :  { %p2770_p0 = scmp.ne.s32.totalorder %s2279_s25, %s2769_s26  ;;  %p2775_p2 = scmp.lt.s32.totalorder %s2769_s26, %s2769_s26 }
 0xab4   :  { %2704 = vmatpush3.bf16.msra.mxu0 %v2935_v16 }
 0xab5   :  { %p2776_p3 = por %p2775_p2, %p2774_p1 }
 0xab7   :  { %p2777_p4 = pnand %p2776_p3, %p2770_p0 }
 0xb82   :  { %v1819_v47 = vpop.f32.mrb[12].mxu0 }
 0xb83   :  { %v1820_v49 = vadd.f32 %v3014_v35, %v1819_v47  ;;  %v2591_v50 = vpop.f32.mrb[13].mxu0 }
 0xb85   :  { %1824 = vst.msk [vmem:[#allocation2 + $0x10] sm:$0xf] %vm42_vm5, %v1820_v49  ;;  %2761 = vtanh.f32 %v1820_v49  ;;  %2602 = vmatmul.mubr.msk.f32.vlgmr.msra.gmra.mrb[12].mxu1 %vm120_vm6, %v1820_v49 }
 0xb86   :  { %2605 = vmatpush3.msk.msra.mxu1 %vm202_vm7, %v2903_v9  ;;  %2606 = vmatprep.mubr.msk.f32.mxu1 %vm2818_vm1, %v2817_v2 }
 0xb87   :  { %2705 = vmatprep.subr.bf16.mxu1 %v2820_v8 }
 0xb8d   :  { %2607 = vmatmul.mubr.msk.f32.vlgmr.msra.gmra.mrb[12].mxu1 %vm198_vm8, %v2343_v13 }
 0xb8e   :  { %2707 = vmatpush3.bf16.msra.mxu1 %v2965_v54  ;;  %2628 = vmatprep.mubr.msk.f32.mxu1 %vm2818_vm1, %v2817_v2 }
 0xb8f   :  { %v2762_v16 = vpop.eup %2761  ;;  %2708 = vmatprep.subr.bf16.mxu1 %v2820_v8 }
 0xb90   :  { %1827 = vrot.lane.b32.xlu1 %v2762_v16, %s2821_s13 }
 0xb92   :  { %2710 = vmatpush3.bf16.msra.mxu1 %v2975_v57 }
 0xc02   :  { %v1828_v9 = vpop.permute.xlu1 %1827 }
 0xc03   :  { %1831 = vst.msk [vmem:[#allocation4 + $0xc] sm:$0xf] %vm507_vm11, %v1828_v9 }
 0xc60   :  { %v2051_v51 = vpop.f32.mrb[12].mxu1 }
 0xc61   :  { %v2056_v52 = vsel %vm277_vm9, %v2051_v51, 0.0  ;;  %v2064_v53 = vmul.f32 %v2051_v51, %v2051_v51  ;;  %v2608_v55 = vpop.f32.mrb[13].mxu1 }
 0xc62   :  { %v2057_v56 = vrot.slane %v2056_v52, 4 }
 0xc63   :  { %v2065_v54 = vsel %vm277_vm9, %v2064_v53, 0.0 }
 0xc64   :  { %v2058_v58 = vadd.f32 %v2057_v56, %v2056_v52  ;;  %v2066_v2 = vrot.slane %v2065_v54, 4 }
 0xc66   :  { %v2059_v59 = vrot.slane %v2058_v58, 2  ;;  %v2067_v60 = vadd.f32 %v2066_v2, %v2065_v54 }
 0xc68   :  { %v2060_v8 = vadd.f32 %v2059_v59, %v2058_v58  ;;  %v2068_v61 = vrot.slane %v2067_v60, 2 }
 0xc6a   :  { %v2061_v62 = vrot.slane %v2060_v8, 1  ;;  %v2069_v63 = vadd.f32 %v2068_v61, %v2067_v60 }
 0xc6c   :  { %v2062_v57 = vadd.f32 %v2061_v62, %v2060_v8  ;;  %v2070_v1 = vrot.slane %v2069_v63, 1 }
 0xc6e   :  { %v2063_v3 = vmul.f32 0.25, %v2062_v57  ;;  %v2071_v4 = vadd.f32 %v2070_v1, %v2069_v63 }
 0xc70   :  { %v2072_v7 = vmul.f32 0.25, %v2071_v4  ;;  %v2073_v10 = vmul.f32 %v2063_v3, %v2063_v3  ;;  %v2079_v17 = vsub.f32 %v2051_v51, %v2063_v3 }
 0xc72   :  { %v2074_v11 = vsub.f32 %v2072_v7, %v2073_v10 }
 0xc74   :  { %v2075_v12 = vmax.f32 %v2074_v11, 0.0 }
 0xc76   :  { %v2076_v0 = vadd.f32 1e-05, %v2075_v12 }
 0xc78   :  { %2763 = vrsqrt.f32 %v2076_v0 }
 0xc82   :  { %v2764_v14 = vpop.eup %2763 }
 0xc83   :  { %v2078_v15 = vmul.f32 %v2764_v14, %v2944_v42 }
 0xc85   :  { %v2083_v18 = vrot.slane %v2078_v15, %v2946_v43 }
 0xc87   :  { %v2084_v19 = vmul.f32 %v2083_v18, %v2079_v17 }
 0xc89   :  { %v2085_v20 = vadd.f32 %v2953_v48, %v2084_v19 }
 0xc8b   :  { %v2086_v21 = vmax.f32 %v2085_v20, 0.0 }
 0xc8d   :  { %2618 = vmatmul.mubr.msk.f32.vlgmr.msra.gmra.mrb[14].mxu0 %vm314_vm10, %v2086_v21 }
 0xd60   :  { %v2156_v22 = vpop.f32.mrb[14].mxu0 }
 0xd61   :  { %v2160_v23 = vsel %vm277_vm9, %v2156_v22, 0.0  ;;  %v2168_v24 = vmul.f32 %v2156_v22, %v2156_v22  ;;  %v2619_v6 = vpop.f32.mrb[15].mxu0 }
 0xd62   :  { %v2161_v5 = vrot.slane %v2160_v23, 4 }
 0xd63   :  { %v2169_v25 = vsel %vm277_vm9, %v2168_v24, 0.0 }
 0xd64   :  { %v2162_v27 = vadd.f32 %v2161_v5, %v2160_v23  ;;  %v2170_v28 = vrot.slane %v2169_v25, 4 }
 0xd66   :  { %v2163_v42 = vrot.slane %v2162_v27, 2  ;;  %v2171_v29 = vadd.f32 %v2170_v28, %v2169_v25 }
 0xd68   :  { %v2164_v30 = vadd.f32 %v2163_v42, %v2162_v27  ;;  %v2172_v32 = vrot.slane %v2171_v29, 2 }
 0xd6a   :  { %v2165_v33 = vrot.slane %v2164_v30, 1  ;;  %v2173_v34 = vadd.f32 %v2172_v32, %v2171_v29 }
 0xd6c   :  { %v2166_v48 = vadd.f32 %v2165_v33, %v2164_v30  ;;  %v2174_v36 = vrot.slane %v2173_v34, 1 }
 0xd6e   :  { %v2167_v37 = vmul.f32 0.25, %v2166_v48  ;;  %v2175_v38 = vadd.f32 %v2174_v36, %v2173_v34 }
 0xd70   :  { %v2176_v39 = vmul.f32 0.25, %v2175_v38  ;;  %v2177_v40 = vmul.f32 %v2167_v37, %v2167_v37  ;;  %v2183_v49 = vsub.f32 %v2156_v22, %v2167_v37 }
 0xd72   :  { %v2178_v41 = vsub.f32 %v2176_v39, %v2177_v40 }
 0xd74   :  { %v2179_v44 = vmax.f32 %v2178_v41, 0.0 }
 0xd76   :  { %v2180_v45 = vadd.f32 1e-05, %v2179_v44 }
 0xd78   :  { %2765 = vrsqrt.f32 %v2180_v45 }
 0xd82   :  { %v2766_v46 = vpop.eup %2765 }
 0xd83   :  { %v2182_v47 = vmul.f32 %v2766_v46, %v2994_v26 }
 0xd85   :  { %v2187_v50 = vrot.slane %v2182_v47, %v2946_v43 }
 0xd87   :  { %v2188_v13 = vmul.f32 %v2187_v50, %v2183_v49 }
 0xd89   :  { %v2189_v16 = vadd.f32 %v3001_v31, %v2188_v13 }
 0xd8b   :  { %v2190_v9 = vmax.f32 %v2189_v16, 0.0 }
 0xd8d   :  { %2629 = vmatmul.mubr.msk.f32.vlgmr.msra.gmra.mrb[14].mxu1 %vm314_vm10, %v2190_v9 }
 0xe60   :  { %v2260_v51 = vpop.f32.mrb[14].mxu1 }
 0xe61   :  { %v2261_v52 = vadd.f32 %v3014_v35, %v2260_v51  ;;  %v2630_v53 = vpop.f32.mrb[15].mxu1 }
 0xe63   :  { %2265 = vst.msk [vmem:[#allocation2 + $0x14] sm:$0xf] %vm42_vm5, %v2261_v52  ;;  %2767 = vtanh.f32 %v2261_v52 }
 0xe64   :  { %2780 = shalt.err (!%p2777_p4)
}
 0xe65   :  { %s2781_s29 = scalar_lea.hbm %s3235_s5, 384 }
 0xe66   :  { %p2782_p5 = scmp.ne.s32.totalorder %s3235_s5, %s2781_s29  ;;  %p2785_p6 = scmp.lt.u32.totalorder %s2781_s29, %s3235_s5 }
 0xe68   :  { %p2787_p7 = pnand %p2785_p6, %p2782_p5 }
 0xe6a   :  { %2790 = shalt.err (!%p2787_p7)
}
 0xe6b   :  { %s2823_s9 = smov 64   ;;  %s2824_s10 = smov 4  }
 0xe6c   :  { %2284 = dma.vmem_to_hbm [thread:$0]  %s2279_s25, 384, %s3235_s5, [#allocation3], %s2823_s9, %s2823_s9, %s2824_s10  }
 0xe6d   :  { %v2768_v43 = vpop.eup %2767  ;;  %s2825_s12 = smov [#allocation4]  }
 0xe6e   :  { %2268 = vrot.lane.b32.xlu0 %v2768_v43, %s2821_s13  ;;  %s2290_s4 = sshll.u32 %s2825_s12, 4  ;;  %s2291_s4 = int_to_ptr.vmem [resolvable:$true] %s2290_s4 }
 0xe6f   :  { %s2791_s14 = scalar_lea.vmem %s2291_s4, 320  ;;  %p2796_p9 = scmp.lt.s32.totalorder %s2291_s4, %s2291_s4 }
 0xe70   :  { %p2792_p8 = scmp.ne.s32.totalorder %s2291_s4, %s2791_s14  ;;  %p2797_p10 = scmp.lt.s32.totalorder %s2791_s14, %s2791_s14 }
 0xe72   :  { %p2798_p11 = por %p2797_p10, %p2796_p9 }
 0xe74   :  { %p2799_p12 = pnand %p2798_p11, %p2792_p8 }
 0xee0   :  { %v2269_v26 = vpop.permute.xlu0 %2268 }
 0xee1   :  { %2272 = vst.msk [vmem:[#allocation4 + $0x10] sm:$0xf] %vm507_vm11, %v2269_v26 }
 0xee2   :  { %2802 = shalt.err (!%p2799_p12)
}
 0xee3   :  { %s2803_s5 = scalar_lea.hbm %s3236_s6, 320 }
 0xee4   :  { %p2804_p13 = scmp.ne.s32.totalorder %s3236_s6, %s2803_s5  ;;  %p2807_p0 = scmp.lt.u32.totalorder %s2803_s5, %s3236_s6 }
 0xee6   :  { %p2809_p1 = pnand %p2807_p0, %p2804_p13 }
 0xee8   :  { %2812 = shalt.err (!%p2809_p1)
}
 0xee9   :  { %2296 = dma.vmem_to_hbm [thread:$0]  %s2291_s4, 320, %s3236_s6, [#allocation5], %s2823_s9, %s2823_s9, %s2824_s10  }
 0xeea   :  { %2813 = dma.done.wait [#allocation3], 384  }
 0xeeb   :  { %2814 = vsyncadd [#allocation3], 4294966912 }
 0xeec   :  { %2815 = dma.done.wait [#allocation5], 320  }
 0xeed   :  { %2816 = vsyncadd [#allocation5], 4294966976 }
 0xeee   :  { %2303 = vsyncpa [#allocation3], 1 }
 0xeef   :  { %2304 = vsyncpa [#allocation5], 1 }

</bundles_post_ra>
